<compile_context>
chip_gen: v7x
topology: tpu7x:2x2x1
jax: 0.10.0
libtpu: 0.0.40
codegen_flags: <defaults>
</compile_context>

<pallas_src>
import functools

import jax
import jax.numpy as jnp
from jax.experimental import pallas as pl
from jax.experimental.pallas import tpu as pltpu


_F32_DOT = functools.partial(jnp.dot, precision=jax.lax.Precision.HIGHEST)


def fastpkg_kernel(to_ref, ti_ref,
                   w1o_ref, w1i_ref, b1_ref,
                   w4_ref, b4_ref,
                   o_ref, h_ref):
    """One batch tile of the fused (folded) MLP + softmax.

    to_ref/ti_ref : [TB, V]  total_out / total_in tile (f32)
    w1o/w1i       : [V, E]   folded (W1@W2@W3) weight, split to avoid the concat
    b1            : [1, E]   folded bias (f32)
    w4 / b4       : [E, V] / [1, V]
    o_ref         : [TB, V]  softmax probabilities
    h_ref         : [TB, E]  hidden after h3 (== output of the folded layer)
    """
    # Layers 1..3 (folded): h = x @ (W1 W2 W3) + (b1 W2 W3 + b2 W3 + b3).
    # Dropout is identity in eval mode; concat eliminated by splitting the
    # contraction over [total_out ; total_in].
    h = (jnp.dot(to_ref[...].astype(jnp.bfloat16), w1o_ref[...],
                 preferred_element_type=jnp.float32)
         + jnp.dot(ti_ref[...].astype(jnp.bfloat16), w1i_ref[...],
                   preferred_element_type=jnp.float32)
         + b1_ref[...])

    # Output layer + softmax over the feature dim (f32 math).
    logits = jnp.dot(h.astype(jnp.bfloat16), w4_ref[...],
                     preferred_element_type=jnp.float32) + b4_ref[...]
    m = jnp.max(logits, axis=-1, keepdims=True)
    e = jnp.exp(logits - m)
    denom = jnp.sum(e, axis=-1, keepdims=True)
    inv = pl.reciprocal(denom, approx=True)       # EUP vrcp — co-issues with VPU/MXU

    o_ref[...] = (e * inv).astype(o_ref.dtype)
    h_ref[...] = h.astype(h_ref.dtype)


def _round_up(x, m):
    return ((x + m - 1) // m) * m


def _resident_spec(shape):
    """Weights/biases: same block every grid step -> VMEM-resident; single-buffered
    (default double-buffering would silently double the resident footprint)."""
    index_map = lambda i: (0,) * len(shape)
    try:
        return pl.BlockSpec(shape, index_map, pipeline_mode=pl.Buffered(1))
    except TypeError:  # older jax without BlockSpec.pipeline_mode
        return pl.BlockSpec(shape, index_map)


def _vmem_limit_bytes(TB, V, E, params):
    # Resident weights/biases (counted x2 in case single-buffering is unavailable).
    resident = 2 * sum(int(p.size) * p.dtype.itemsize for p in params.values())
    # Per-step pipelined activation tiles: 2 f32 inputs [TB,V]; outputs [TB,V]+[TB,E].
    per_step_io = 4 * (2 * TB * V + TB * V + TB * E)
    # In-kernel intermediates (f32 h/logits/e + bf16 input copies), rough.
    scratch = 4 * TB * (2 * V + E) + 2 * (2 * TB * V)
    budget = int(1.5 * (resident + 2 * per_step_io + scratch)) + (4 << 20)
    try:
        cap = int(pltpu.get_tpu_info().vmem_capacity_bytes)
    except Exception:
        cap = 64 << 20            # conservative: v7x per-TensorCore VMEM
    return max(min(budget, cap - (12 << 20)), 16 << 20)


def fastpkg_forward(total_out, total_in, params, *, tb=256):
    """Batch-tiled fused forward.  `params` are the folded kernel parameters."""
    B, V = total_out.shape
    E = params["w1_out"].shape[1]

    # Batch tile: fill the 256-wide MXU (v6e/v7x) while keeping >= 2 grid steps
    # so ("parallel",) can shard across v7x's two TensorCores.
    if B >= 2 * 128:
        TB = tb
        while TB > 128 and B < 2 * TB:
            TB //= 2
    else:
        TB = min(tb, _round_up(B, 8))
    B_pad = _round_up(B, TB)
    if B_pad != B:
        pad = ((0, B_pad - B), (0, 0))
        total_out = jnp.pad(total_out, pad)
        total_in = jnp.pad(total_in, pad)
    grid = (B_pad // TB,)

    act_in = lambda feat: pl.BlockSpec((TB, feat), lambda i: (i, 0))

    grid_spec = pltpu.PrefetchScalarGridSpec(
        num_scalar_prefetch=0,
        grid=grid,
        in_specs=[
            act_in(V), act_in(V),
            _resident_spec(params["w1_out"].shape),
            _resident_spec(params["w1_in"].shape),
            _resident_spec(params["b1"].shape),
            _resident_spec(params["w4"].shape),
            _resident_spec(params["b4"].shape),
        ],
        out_specs=(
            pl.BlockSpec((TB, V), lambda i: (i, 0)),
            pl.BlockSpec((TB, E), lambda i: (i, 0)),
        ),
    )

    # NOTE: if the consumer allows, switch these to bf16 — halves vst/HBM
    # writeback traffic (largest relative win on v5e's single store slot).
    o, h = pl.pallas_call(
        fastpkg_kernel,
        out_shape=(
            jax.ShapeDtypeStruct((B_pad, V), jnp.float32),   # softmax probs
            jax.ShapeDtypeStruct((B_pad, E), jnp.float32),   # hidden h
        ),
        grid_spec=grid_spec,
        compiler_params=pltpu.CompilerParams(
            dimension_semantics=("parallel",),
            vmem_limit_bytes=_vmem_limit_bytes(TB, V, E, params),
        ),
    )(
        total_out, total_in,
        params["w1_out"], params["w1_in"], params["b1"],
        params["w4"], params["b4"],
    )
    if B_pad != B:
        o, h = o[:B], h[:B]
    return o, h


def init_raw_params(key, vocab_size, emb_size):
    """Synthetic f32 parameters with PyTorch nn.Linear-style init, stored [in, out]."""
    ks = jax.random.split(key, 8)

    def lin(kw, kb, fan_in, fan_out):
        bound = 1.0 / jnp.sqrt(fan_in)
        w = jax.random.uniform(kw, (fan_in, fan_out), jnp.float32, -bound, bound)
        b = jax.random.uniform(kb, (1, fan_out), jnp.float32, -bound, bound)
        return w, b

    w1, b1 = lin(ks[0], ks[1], 2 * vocab_size, emb_size)
    w2, b2 = lin(ks[2], ks[3], emb_size, emb_size)
    w3, b3 = lin(ks[4], ks[5], emb_size, emb_size)
    w4, b4 = lin(ks[6], ks[7], emb_size, vocab_size)
    return dict(w1=w1, b1=b1, w2=w2, b2=b2, w3=w3, b3=b3, w4=w4, b4=b4)


def fold_params(raw, vocab_size):
    """Fold the activation-free Linear chain W1->W2->W3 (exact in f32), then cast
    weights to bf16 for the MXU.  Valid for inference (static weights)."""
    w23 = _F32_DOT(raw["w2"], raw["w3"])
    w123 = _F32_DOT(raw["w1"], w23)                                   # [2V, E]
    b123 = _F32_DOT(raw["b1"], w23) + _F32_DOT(raw["b2"], raw["w3"]) + raw["b3"]
    V = vocab_size
    return {
        "w1_out": w123[:V].astype(jnp.bfloat16),
        "w1_in": w123[V:].astype(jnp.bfloat16),
        "b1": b123,
        "w4": raw["w4"].astype(jnp.bfloat16),
        "b4": raw["b4"],
    }


def reference_forward_f32(total_out, total_in, raw):
    """Unfolded full-f32 reference matching the PyTorch module in eval mode."""
    x = jnp.concatenate([total_out, total_in], axis=1)
    h = _F32_DOT(x, raw["w1"]) + raw["b1"]
    h = _F32_DOT(h, raw["w2"]) + raw["b2"]
    h = _F32_DOT(h, raw["w3"]) + raw["b3"]
    o = jax.nn.softmax(_F32_DOT(h, raw["w4"]) + raw["b4"], axis=1)
    return o, h


def reference_forward_folded(total_out, total_in, p):
    """Folded bf16-weight reference: same math recipe as the kernel."""
    mm = lambda a, w: jnp.dot(a.astype(jnp.bfloat16), w,
                              preferred_element_type=jnp.float32)
    h = mm(total_out, p["w1_out"]) + mm(total_in, p["w1_in"]) + p["b1"]
    o = jax.nn.softmax(mm(h, p["w4"]) + p["b4"], axis=1)
    return o, h


if __name__ == "__main__":
    # Lane-dense demo shapes: feature dims multiples of 128, TB=256 with grid=2
    # (one tile per TensorCore on v7x, full 256-wide MXU occupancy on v6e/v7x).
    B, V, E = 512, 128, 128   # batch, vocab_size, emb_size

    key = jax.random.PRNGKey(0)
    k_out, k_in, k_p = jax.random.split(key, 3)
    total_out = jax.random.normal(k_out, (B, V), jnp.float32)
    total_in = jax.random.normal(k_in, (B, V), jnp.float32)
    raw = init_raw_params(k_p, V, E)
    params = fold_params(raw, V)

    o, h = jax.block_until_ready(fastpkg_forward(total_out, total_in, params))

    assert o.shape == (B, V) and h.shape == (B, E)

    # Tight check: identical math recipe (folded bf16 weights, f32 accumulation).
    o_f, h_f = reference_forward_folded(total_out, total_in, params)
    assert jnp.allclose(h, h_f, atol=2e-3, rtol=2e-3)
    assert jnp.allclose(o, o_f, atol=2e-3, rtol=2e-3)

    # Semantic check vs. the unfolded f32 chain (original module, eval mode).
    o_r, h_r = reference_forward_f32(total_out, total_in, raw)
    assert jnp.allclose(h, h_r, atol=2e-2, rtol=2e-2)
    assert jnp.allclose(o, o_r, atol=2e-2, rtol=2e-2)

    assert jnp.allclose(jnp.sum(o, axis=1), 1.0, atol=2e-3)

    print("KERNEL_OK")
</pallas_src>

<mosaic_0001>
module attributes {stable_mosaic.version = 11 : i64} {
  func.func @fastpkg_kernel(%arg0: i32, %arg1: memref<256x128xf32, #tpu.memory_space<vmem>>, %arg2: memref<256x128xf32, #tpu.memory_space<vmem>>, %arg3: memref<128x128xbf16, #tpu.memory_space<vmem>>, %arg4: memref<128x128xbf16, #tpu.memory_space<vmem>>, %arg5: memref<1x128xf32, #tpu.memory_space<vmem>>, %arg6: memref<128x128xbf16, #tpu.memory_space<vmem>>, %arg7: memref<1x128xf32, #tpu.memory_space<vmem>>, %arg8: memref<256x128xf32, #tpu.memory_space<vmem>>, %arg9: memref<256x128xf32, #tpu.memory_space<vmem>>) attributes {dimension_semantics = [#tpu.dimension_semantics<parallel>], iteration_bounds = array<i64: 2>, scalar_prefetch = 0 : i64, scratch_operands = 0 : i64, tpu.core_type = #tpu.core_type<tc>, window_params = [{transform_indices = @transform_0, window_bounds = array<i64: 256, 128>}, {transform_indices = @transform_1, window_bounds = array<i64: 256, 128>}, {pipeline_mode = #tpu.pipeline_mode<synchronous>, transform_indices = @transform_2, window_bounds = array<i64: 128, 128>}, {pipeline_mode = #tpu.pipeline_mode<synchronous>, transform_indices = @transform_3, window_bounds = array<i64: 128, 128>}, {pipeline_mode = #tpu.pipeline_mode<synchronous>, transform_indices = @transform_4, window_bounds = array<i64: 1, 128>}, {pipeline_mode = #tpu.pipeline_mode<synchronous>, transform_indices = @transform_5, window_bounds = array<i64: 128, 128>}, {pipeline_mode = #tpu.pipeline_mode<synchronous>, transform_indices = @transform_6, window_bounds = array<i64: 1, 128>}, {transform_indices = @transform_7, window_bounds = array<i64: 256, 128>}, {transform_indices = @transform_8, window_bounds = array<i64: 256, 128>}]} {
    %c0 = arith.constant 0 : index
    %c0_0 = arith.constant 0 : index
    %0 = vector.load %arg1[%c0, %c0_0] : memref<256x128xf32, #tpu.memory_space<vmem>>, vector<256x128xf32>
    %1 = arith.truncf %0 : vector<256x128xf32> to vector<256x128xbf16>
    %c0_1 = arith.constant 0 : index
    %c0_2 = arith.constant 0 : index
    %2 = vector.load %arg3[%c0_1, %c0_2] : memref<128x128xbf16, #tpu.memory_space<vmem>>, vector<128x128xbf16>
    %cst = arith.constant dense<0.000000e+00> : vector<256x128xf32>
    %3 = tpu.matmul %1, %2, %cst {dimension_numbers = #tpu.dot_dimension_numbers<[1], [0], [0], [1], [0, 0, 1, 1], [], []>} : vector<256x128xbf16>, vector<128x128xbf16>, vector<256x128xf32> -> vector<256x128xf32>
    %c0_3 = arith.constant 0 : index
    %c0_4 = arith.constant 0 : index
    %4 = vector.load %arg2[%c0_3, %c0_4] : memref<256x128xf32, #tpu.memory_space<vmem>>, vector<256x128xf32>
    %5 = arith.truncf %4 : vector<256x128xf32> to vector<256x128xbf16>
    %c0_5 = arith.constant 0 : index
    %c0_6 = arith.constant 0 : index
    %6 = vector.load %arg4[%c0_5, %c0_6] : memref<128x128xbf16, #tpu.memory_space<vmem>>, vector<128x128xbf16>
    %cst_7 = arith.constant dense<0.000000e+00> : vector<256x128xf32>
    %7 = tpu.matmul %5, %6, %cst_7 {dimension_numbers = #tpu.dot_dimension_numbers<[1], [0], [0], [1], [0, 0, 1, 1], [], []>} : vector<256x128xbf16>, vector<128x128xbf16>, vector<256x128xf32> -> vector<256x128xf32>
    %8 = arith.addf %3, %7 : vector<256x128xf32>
    %c0_8 = arith.constant 0 : index
    %c0_9 = arith.constant 0 : index
    %9 = vector.load %arg5[%c0_8, %c0_9] : memref<1x128xf32, #tpu.memory_space<vmem>>, vector<1x128xf32>
    %10 = vector.broadcast %9 : vector<1x128xf32> to vector<256x128xf32>
    %11 = arith.addf %8, %10 : vector<256x128xf32>
    %12 = arith.truncf %11 : vector<256x128xf32> to vector<256x128xbf16>
    %c0_10 = arith.constant 0 : index
    %c0_11 = arith.constant 0 : index
    %13 = vector.load %arg6[%c0_10, %c0_11] : memref<128x128xbf16, #tpu.memory_space<vmem>>, vector<128x128xbf16>
    %cst_12 = arith.constant dense<0.000000e+00> : vector<256x128xf32>
    %14 = tpu.matmul %12, %13, %cst_12 {dimension_numbers = #tpu.dot_dimension_numbers<[1], [0], [0], [1], [0, 0, 1, 1], [], []>} : vector<256x128xbf16>, vector<128x128xbf16>, vector<256x128xf32> -> vector<256x128xf32>
    %c0_13 = arith.constant 0 : index
    %c0_14 = arith.constant 0 : index
    %15 = vector.load %arg7[%c0_13, %c0_14] : memref<1x128xf32, #tpu.memory_space<vmem>>, vector<1x128xf32>
    %16 = vector.broadcast %15 : vector<1x128xf32> to vector<256x128xf32>
    %17 = arith.addf %14, %16 : vector<256x128xf32>
    %cst_15 = arith.constant dense<0xFF800000> : vector<256xf32>
    %18 = vector.multi_reduction <maximumf>, %17, %cst_15 [1] : vector<256x128xf32> to vector<256xf32>
    %19 = vector.shape_cast %18 : vector<256xf32> to vector<256x1xf32>
    %20 = vector.broadcast %19 : vector<256x1xf32> to vector<256x128xf32>
    %21 = arith.subf %17, %20 : vector<256x128xf32>
    %22 = math.exp %21 : vector<256x128xf32>
    %cst_16 = arith.constant dense<0.000000e+00> : vector<256xf32>
    %23 = vector.multi_reduction <add>, %22, %cst_16 [1] : vector<256x128xf32> to vector<256xf32>
    %24 = vector.shape_cast %23 : vector<256xf32> to vector<256x1xf32>
    %25 = tpu.reciprocal %24 {approx = true} : vector<256x1xf32> -> vector<256x1xf32>
    %26 = vector.broadcast %25 : vector<256x1xf32> to vector<256x128xf32>
    %27 = arith.mulf %22, %26 : vector<256x128xf32>
    %c0_17 = arith.constant 0 : index
    %c0_18 = arith.constant 0 : index
    %28 = vector.load %arg8[%c0_17, %c0_18] : memref<256x128xf32, #tpu.memory_space<vmem>>, vector<256x128xf32>
    tpu.vector_store %arg8[%c0_17, %c0_18], %27 {strides = array<i32>} : memref<256x128xf32, #tpu.memory_space<vmem>>, vector<256x128xf32>,
    %c0_19 = arith.constant 0 : index
    %c0_20 = arith.constant 0 : index
    %29 = vector.load %arg9[%c0_19, %c0_20] : memref<256x128xf32, #tpu.memory_space<vmem>>, vector<256x128xf32>
    tpu.vector_store %arg9[%c0_19, %c0_20], %11 {strides = array<i32>} : memref<256x128xf32, #tpu.memory_space<vmem>>, vector<256x128xf32>,
    return
  }
  func.func @transform_0(%arg0: i32) -> (i32, i32) {
    %c0_i32 = arith.constant 0 : i32
    %c0_i32_0 = arith.constant 0 : i32
    return %arg0, %c0_i32 : i32, i32
  }
  func.func @transform_1(%arg0: i32) -> (i32, i32) {
    %c0_i32 = arith.constant 0 : i32
    %c0_i32_0 = arith.constant 0 : i32
    return %arg0, %c0_i32 : i32, i32
  }
  func.func @transform_2(%arg0: i32) -> (i32, i32) {
    %c0_i32 = arith.constant 0 : i32
    %c0_i32_0 = arith.constant 0 : i32
    %c0_i32_1 = arith.constant 0 : i32
    return %c0_i32, %c0_i32_0 : i32, i32
  }
  func.func @transform_3(%arg0: i32) -> (i32, i32) {
    %c0_i32 = arith.constant 0 : i32
    %c0_i32_0 = arith.constant 0 : i32
    %c0_i32_1 = arith.constant 0 : i32
    return %c0_i32, %c0_i32_0 : i32, i32
  }
  func.func @transform_4(%arg0: i32) -> (i32, i32) {
    %c0_i32 = arith.constant 0 : i32
    %c0_i32_0 = arith.constant 0 : i32
    %c0_i32_1 = arith.constant 0 : i32
    return %c0_i32, %c0_i32_0 : i32, i32
  }
  func.func @transform_5(%arg0: i32) -> (i32, i32) {
    %c0_i32 = arith.constant 0 : i32
    %c0_i32_0 = arith.constant 0 : i32
    %c0_i32_1 = arith.constant 0 : i32
    return %c0_i32, %c0_i32_0 : i32, i32
  }
  func.func @transform_6(%arg0: i32) -> (i32, i32) {
    %c0_i32 = arith.constant 0 : i32
    %c0_i32_0 = arith.constant 0 : i32
    %c0_i32_1 = arith.constant 0 : i32
    return %c0_i32, %c0_i32_0 : i32, i32
  }
  func.func @transform_7(%arg0: i32) -> (i32, i32) {
    %c0_i32 = arith.constant 0 : i32
    %c0_i32_0 = arith.constant 0 : i32
    return %arg0, %c0_i32 : i32, i32
  }
  func.func @transform_8(%arg0: i32) -> (i32, i32) {
    %c0_i32 = arith.constant 0 : i32
    %c0_i32_0 = arith.constant 0 : i32
    return %arg0, %c0_i32 : i32, i32
  }
}

</mosaic_0001>

<bundles_post_ra>
// kernel: tpu_custom_call.1
= control target key start
LH: loop header
LB: loop body
LE: loop exit
PB: predicated region body
PF: predicated region fallthrough
CT: control target
= control target key end

     0   :  { %s3564_s0 = inlined_call_operand.hbm [shape: f32[512,128], index: 0, kind: input, shape index: {}]   ;;  %s3565_s1 = inlined_call_operand.hbm [shape: f32[512,128], index: 1, kind: input, shape index: {}]   ;;  %s3566_s2 = inlined_call_operand.hbm [shape: bf16[128,128], index: 2, kind: input, shape index: {}]   ;;  %s3567_s3 = inlined_call_operand.hbm [shape: bf16[128,128], index: 3, kind: input, shape index: {}]   ;;  %s3568_s4 = inlined_call_operand.vmem [shape: f32[1,128], index: 4, kind: input, shape index: {}]   ;;  %s3569_s5 = inlined_call_operand.hbm [shape: bf16[128,128], index: 5, kind: input, shape index: {}]   ;;  %s3570_s6 = inlined_call_operand.vmem [shape: f32[1,128], index: 6, kind: input, shape index: {}]   ;;  %s3571_s7 = inlined_call_operand.hbm [shape: f32[512,128], index: 7, kind: output, shape index: {0}]   ;;  %s3572_s8 = inlined_call_operand.hbm [shape: f32[512,128], index: 8, kind: output, shape index: {1}]  }
   0x1   :  { %3578 = sst [smem:[#allocation22_spill]] %s3564_s0 }
   0x2   :  { %3579 = sst [smem:[#allocation23_spill]] %s3566_s2 }
   0x3   :  { %3580 = sst [smem:[#allocation24_spill]] %s3567_s3 }
   0x4   :  { %14 = vsyncpa [#allocation3], 0 }
   0x5   :  { %16 = vsyncpa [#allocation3 + $0x1], 0 }
   0x6   :  { %17 = vsyncpa [#allocation6], 0 }
   0x7   :  { %19 = vsyncpa [#allocation6 + $0x1], 0 }
   0x8   :  { %20 = vsyncpa [#allocation9], 0 }
   0x9   :  { %21 = vsyncpa [#allocation4], 0 }
   0xa   :  { %23 = vsyncpa [#allocation4 + $0x1], 0 }
   0xb   :  { %24 = vsyncpa [#allocation13], 0 }
   0xc   :  { %26 = vsyncpa [#allocation13 + $0x1], 0  ;;  %s2680_s27 = smov 0   ;;  %s2682_s28 = smov 0  }
   0xd   :  { %s2684_s29 = smov 0   ;;  %s2686_s30 = smov 0  }
   0xe LB: > { %3581 = sst [smem:[#allocation20_spill]] %s2608_s27  ;;  %s2701_s9 = sadd.s32 4294967295, %s2620_s30   ;;  %s2620_s30 = sphi %s2686_s30, %s3607_s30   ;;  %s2616_s29 = sphi %s2684_s29, %s3606_s29   ;;  %s2612_s28 = sphi %s2682_s28, %s3605_s28   ;;  %s2608_s27 = sphi %s2680_s27, %s3604_s27  }
   0xf   : > { %s1799_s10 = sadd.s32 4294967294, %s2620_s30   ;;  %p52_p0 = scmp.ne.s32.totalorder %s2612_s28, %s2608_s27 }
  0x10   : > { %p3573_p1 = scmp.eq.s32.totalorder %s2701_s9, 0  ;;  %p213_p3 = scmp.eq.s32.totalorder %s1799_s10, 1 }
  0x11   : > { %p1800_p5 = scmp.ge.s32.totalorder %s2620_s30, 1  ;;  %p246_p7 = scmp.lt.s32.totalorder %s2620_s30, 3 }
  0x12   : > { %p2710_p4 = por %p3573_p1, %p52_p0  ;;  %p2715_p6 = por %p213_p3, %p52_p0 }
  0x13   : > { %p2720_p8 = pnand %p1800_p5, %p246_p7  ;;  %s2622_s14 = smov [#allocation7]  }
  0x14   : > { %s3582_s11 = scalar_select %p2710_p4, 1, 0 }
  0x15   : > { %s3583_s12 = scalar_select %p2715_p6, 1, 0 }
  0x16   : > { %s3585_s13 = scalar_select %p2720_p8, 1, 0 }
  0x17   : > { %3584 = sst [smem:[#allocation21_spill]] %s3583_s12  ;;  %s258_s15 = sshll.u32 %s2622_s14, 4  ;;  %s2724_s15 = int_to_ptr.vmem [resolvable:$true] %s258_s15 }
  0x18   : > { %p2141_p9 = pneg %p2720_p8  ;;  %s2623_s17 = smov [#allocation8]  }
  0x19   : > { %s271_s18 = sshll.u32 %s2623_s17, 4  ;;  %s2624_s19 = smov [#allocation10]   ;;  %s2735_s18 = int_to_ptr.vmem [resolvable:$true] %s271_s18 }
  0x1a   : > { %p2731_p11 = pnand %p2141_p9, %p3573_p1  ;;  %s2737_s20 = sshll.u32 %s2624_s19, 4  ;;  %s288_s20 = int_to_ptr.vmem [resolvable:$true] %s2737_s20 }
  0x1b   : > { %s3587_s2 = sld [smem:[#allocation23_spill]] }
  0x1c   : > { %p2747_p13 = pneg %p2731_p11 }
  0x21   : > { %s2366_s23 = scalar_lea.hbm %s3587_s2, 1024 }
  0x22   : > { %p2367_p12 = scmp.ne.s32.totalorder %s3587_s2, %s2366_s23  ;;  %p2373_p5 = scmp.lt.u32.totalorder %s2366_s23, %s3587_s2 }
  0x24   : > { %p2369_p0 = pnand %p2747_p13, %p2367_p12 }
  0x26   : > { %p2370_p3 = pneg %p2369_p0 }
  0x28   : > { %p2375_p7 = pnand %p2373_p5, %p2370_p3 }
  0x2a   : > { %2378 = shalt.err (!%p2375_p7)
}
  0x2b   : > { %s2379_s17 = scalar_lea.vmem %s2724_s15, 1024  ;;  %p2387_p2 = scmp.lt.s32.totalorder %s2724_s15, %s2724_s15 }
  0x2c   : > { %p2380_p9 = scmp.ne.s32.totalorder %s2724_s15, %s2379_s17  ;;  %p2388_p6 = scmp.lt.s32.totalorder %s2379_s17, %s2379_s17 }
  0x2e   : > { %p2382_p10 = pnand %p2380_p9, %p2747_p13  ;;  %p2389_p12 = por %p2388_p6, %p2387_p2 }
  0x30   : > { %p2383_p1 = pneg %p2382_p10 }
  0x32   : > { %p2390_p0 = pnand %p2389_p12, %p2383_p1 }
  0x34   : > { %2393 = shalt.err (!%p2390_p0)
}
  0x35   : > { %s2625_s19 = smov 64   ;;  %s2626_s21 = smov 4  }
  0x36   : > { %2144 = dma.hbm_to_vmem [thread:$0]  (!%p2731_p11), %s3587_s2, 1024, %s2724_s15, [#allocation6], %s2625_s19, %s2625_s19, %s2626_s21  }
  0x37   : > { %s3589_s3 = sld [smem:[#allocation24_spill]] }
  0x3d   : > { %s2394_s10 = scalar_lea.hbm %s3589_s3, 1024 }
  0x3e   : > { %p2395_p1 = scmp.ne.s32.totalorder %s3589_s3, %s2394_s10  ;;  %p2401_p10 = scmp.lt.u32.totalorder %s2394_s10, %s3589_s3 }
  0x40   : > { %p2397_p2 = pnand %p2395_p1, %p2747_p13 }
  0x42   : > { %p2398_p6 = pneg %p2397_p2 }
  0x44   : > { %p2403_p3 = pnand %p2401_p10, %p2398_p6 }
  0x46   : > { %2406 = shalt.err (!%p2403_p3)
}
  0x47   : > { %s2407_s15 = scalar_lea.vmem %s2735_s18, 1024  ;;  %p2415_p12 = scmp.lt.s32.totalorder %s2735_s18, %s2735_s18 }
  0x48   : > { %p2408_p5 = scmp.ne.s32.totalorder %s2735_s18, %s2407_s15  ;;  %p2416_p0 = scmp.lt.s32.totalorder %s2407_s15, %s2407_s15 }
  0x4a   : > { %p2410_p7 = pnand %p2408_p5, %p2747_p13  ;;  %p2417_p1 = por %p2416_p0, %p2415_p12 }
  0x4c   : > { %p2411_p9 = pneg %p2410_p7 }
  0x4e   : > { %p2418_p2 = pnand %p2417_p1, %p2411_p9 }
  0x50   : > { %2421 = shalt.err (!%p2418_p2)
}
  0x51   : > { %2147 = dma.hbm_to_vmem [thread:$0]  (!%p2731_p11), %s3589_s3, 1024, %s2735_s18, [#allocation9], %s2625_s19, %s2625_s19, %s2626_s21  }
  0x52   : > { %s2422_s24 = scalar_lea.hbm %s3569_s5, 1024 }
  0x53   : > { %p2423_p6 = scmp.ne.s32.totalorder %s3569_s5, %s2422_s24  ;;  %p2429_p5 = scmp.lt.u32.totalorder %s2422_s24, %s3569_s5 }
  0x55   : > { %p2425_p10 = pnand %p2423_p6, %p2747_p13 }
  0x57   : > { %p2426_p3 = pneg %p2425_p10 }
  0x59   : > { %p2431_p7 = pnand %p2429_p5, %p2426_p3 }
  0x5b   : > { %2434 = shalt.err (!%p2431_p7)
}
  0x5c   : > { %s2435_s15 = scalar_lea.vmem %s288_s20, 1024  ;;  %p2443_p1 = scmp.lt.s32.totalorder %s288_s20, %s288_s20 }
  0x5d   : > { %p2436_p9 = scmp.ne.s32.totalorder %s288_s20, %s2435_s15  ;;  %p2444_p2 = scmp.lt.s32.totalorder %s2435_s15, %s2435_s15 }
  0x5f   : > { %p2438_p12 = pnand %p2436_p9, %p2747_p13  ;;  %p2445_p4 = por %p2444_p2, %p2443_p1 }
  0x61   : > { %p2439_p0 = pneg %p2438_p12 }
  0x63   : > { %p2446_p8 = pnand %p2445_p4, %p2439_p0 }
  0x65   : > { %2449 = shalt.err (!%p2446_p8)
}
  0x66   : > { %2150 = dma.hbm_to_vmem [thread:$0]  (!%p2731_p11), %s3569_s5, 1024, %s288_s20, [#allocation9], %s2625_s19, %s2625_s19, %s2626_s21  }
  0x67   : > { %s2820_s16 = sadd.s32 1, %s2620_s30   ;;  %s39_s12 = sadd.s32 1, %s2616_s29 }
  0x68   : > { %s36_s26 = ssub.s32 %s2620_s30, %s2820_s16  ;;  %p46_p8 = scmp.ne.s32.totalorder %s2616_s29, %s2612_s28 }
  0x69   : > { %p37_p4 = scmp.eq.s32.totalorder %s36_s26, 0  ;;  %p47_p13 = scmp.eq.s32.totalorder %s2620_s30, 0 }
  0x6a   : > { %p2168_p6 = scmp.lt.s32.totalorder %s2620_s30, 2  ;;  %p3590_p3 = scmp.eq.s32.totalorder %s2701_s9, 1 }
  0x6b   : > { %s2830_s22 = scalar_select %p37_p4, %s2616_s29, %s39_s12  }
  0x6c   : > { %p48_p10 = por %p47_p13, %p46_p8  ;;  %p2834_p5 = por %p3590_p3, %p46_p8 }
  0x6d   : > { %s304_s24 = sand.u32 1, %s2616_s29   ;;  %s1853_s25 = sshll.u32 %s2620_s30, 12 }
  0x6e   : > { %s2840_s20 = sshll.u32 %s304_s24, 8  ;;  %s3592_s0 = sld [smem:[#allocation22_spill]] }
  0x6f   : > { %s308_s14 = scalar_lea.vmem [#allocation2], %s2840_s20  ;;  %p2850_p11 = pnand %p2168_p6, %p48_p10 }
  0x70   : > { %s315_s17 = sshll.u32 %s308_s14, 4  ;;  %s2856_s18 = scalar_lea.sflag [#allocation3], %s304_s24  ;;  %s2854_s17 = int_to_ptr.vmem [resolvable:$true] %s315_s17 }
  0x71   : > { %p2452_p9 = pneg %p2850_p11 }
  0x74   : > { %s2847_s10 = scalar_lea.hbm %s3592_s0, %s1853_s25  ;;  %s2455_s19 = scalar_lea.hbm %s3592_s0, 8192 }
  0x75   : > { %s2450_s27 = scalar_lea.hbm %s2847_s10, 4096  ;;  %p2456_p1 = scmp.lt.u32.totalorder %s2847_s10, %s3592_s0 }
  0x76   : > { %p2451_p7 = scmp.ne.s32.totalorder %s2847_s10, %s2450_s27  ;;  %p2457_p2 = scmp.lt.u32.totalorder %s2455_s19, %s2450_s27 }
  0x77   : > { %p2459_p8 = scmp.lt.u32.totalorder %s2450_s27, %s2847_s10 }
  0x78   : > { %p2453_p12 = pnand %p2452_p9, %p2451_p7  ;;  %p2458_p4 = por %p2457_p2, %p2456_p1 }
  0x7a   : > { %p2454_p0 = pneg %p2453_p12  ;;  %p2460_p13 = por %p2459_p8, %p2458_p4 }
  0x7c   : > { %p2461_p6 = pnand %p2460_p13, %p2454_p0 }
  0x7e   : > { %2464 = shalt.err (!%p2461_p6)
}
  0x7f   : > { %s2465_s24 = scalar_lea.vmem %s2854_s17, 4096  ;;  %s2627_s26 = smov [#allocation2]  }
  0x80   : > { %p2466_p10 = scmp.ne.s32.totalorder %s2854_s17, %s2465_s24  ;;  %s2470_s12 = sshll.u32 %s2627_s26, 4  ;;  %s2471_s12 = int_to_ptr.vmem [resolvable:$false] %s2470_s12 }
  0x81   : > { %s2472_s21 = scalar_lea.vmem %s2471_s12, 8192  ;;  %p2473_p12 = scmp.lt.s32.totalorder %s2854_s17, %s2471_s12 }
  0x82   : > { %p2468_p3 = pnand %p2466_p10, %p2452_p9  ;;  %p2474_p1 = scmp.lt.s32.totalorder %s2472_s21, %s2465_s24 }
  0x84   : > { %p2469_p7 = pneg %p2468_p3  ;;  %p2475_p2 = por %p2474_p1, %p2473_p12 }
  0x86   : > { %p2476_p4 = pnand %p2475_p2, %p2469_p7 }
  0x88   : > { %2479 = shalt.err (!%p2476_p4)
}
  0x89   : > { %s2628_s27 = smov 128   ;;  %s2629_s19 = smov 8  }
  0x8a   : > { %2154 = dma.hbm_to_vmem [thread:$0]  (!%p2850_p11), %s2847_s10, 4096, %s2854_s17, %s2856_s18, %s2628_s27, %s2628_s27, %s2629_s19  }
  0x8b   : > { %s2892_s26 = scalar_lea.hbm %s3565_s1, %s1853_s25  ;;  %s329_s12 = scalar_lea.vmem [#allocation5], %s2840_s20 }
  0x8c   : > { %s336_s21 = sshll.u32 %s329_s12, 4  ;;  %s325_s0 = sand.u32 1, %s2620_s30   ;;  %s2896_s21 = int_to_ptr.vmem [resolvable:$true] %s336_s21 }
  0x8d   : > { %s2898_s2 = scalar_lea.sflag [#allocation6], %s325_s0  ;;  %s2480_s3 = scalar_lea.hbm %s2892_s26, 4096 }
  0x8e   : > { %p2481_p0 = scmp.ne.s32.totalorder %s2892_s26, %s2480_s3  ;;  %s2485_s17 = scalar_lea.hbm %s3565_s1, 8192 }
  0x8f   : > { %p2486_p6 = scmp.lt.u32.totalorder %s2892_s26, %s3565_s1  ;;  %p2487_p10 = scmp.lt.u32.totalorder %s2485_s17, %s2480_s3 }
  0x90   : > { %p2483_p8 = pnand %p2481_p0, %p2452_p9  ;;  %p2489_p7 = scmp.lt.u32.totalorder %s2480_s3, %s2892_s26 }
  0x91   : > { %p2488_p3 = por %p2487_p10, %p2486_p6 }
  0x92   : > { %p2484_p13 = pneg %p2483_p8 }
  0x93   : > { %p2490_p12 = por %p2489_p7, %p2488_p3 }
  0x95   : > { %p2491_p1 = pnand %p2490_p12, %p2484_p13 }
  0x97   : > { %2494 = shalt.err (!%p2491_p1)
}
  0x98   : > { %s2495_s0 = scalar_lea.vmem %s2896_s21, 4096  ;;  %s2630_s20 = smov [#allocation5]  }
  0x99   : > { %p2496_p2 = scmp.ne.s32.totalorder %s2896_s21, %s2495_s0  ;;  %s2500_s24 = sshll.u32 %s2630_s20, 4  ;;  %s2501_s24 = int_to_ptr.vmem [resolvable:$false] %s2500_s24 }
  0x9a   : > { %s2502_s12 = scalar_lea.vmem %s2501_s24, 8192  ;;  %p2503_p8 = scmp.lt.s32.totalorder %s2896_s21, %s2501_s24 }
  0x9b   : > { %p2498_p4 = pnand %p2496_p2, %p2452_p9  ;;  %p2504_p6 = scmp.lt.s32.totalorder %s2502_s12, %s2495_s0 }
  0x9d   : > { %p2499_p0 = pneg %p2498_p4  ;;  %p2505_p10 = por %p2504_p6, %p2503_p8 }
  0x9f   : > { %p2506_p3 = pnand %p2505_p10, %p2499_p0 }
  0xa1   : > { %2509 = shalt.err (!%p2506_p3)
}
  0xa2   : > { %2157 = dma.hbm_to_vmem [thread:$0]  (!%p2850_p11), %s2892_s26, 4096, %s2896_s21, %s2898_s2, %s2628_s27, %s2628_s27, %s2629_s19  }
  0xa3   : > { %p3594_p9 = scmp.ne.s32.totalorder %s3585_s13, 0 }
  0xa4   : > { %s2930_s3 = sand.u32 (!%p3594_p9), 1, %s2612_s28   ;;  %p3595_p13 = scmp.ne.s32.totalorder (!%p3594_p9), %s3582_s11, 0 }
  0xa5   : > { %348 = sbr.rel (%p3594_p9) target bundleno = 1073 (0x431), region = 48  ;;  %s2933_s10 = sshll.u32 (!%p3594_p9), %s2930_s3, 8 }
  0xa6   : > { %s351_s15 = scalar_lea.sflag (!%p3594_p9), [#allocation3], %s2930_s3  ;;  %s2937_s25 = scalar_lea.vmem (!%p3594_p9), [#allocation2], %s2933_s10 }
  0xac   : > { %2583 = dma.done.wait (%p3595_p13), %s351_s15, 4096  }
  0xad   : > { %2585 = vsyncadd (%p3595_p13), %s351_s15, 4294963200  ;;  %s359_s2 = sand.u32 1, %s2701_s9   ;;  %s2945_s27 = scalar_lea.vmem [#allocation5], %s2933_s10 }
  0xae   : > { %s360_s13 = scalar_lea.sflag [#allocation6], %s359_s2 }
  0xaf   : > { %2587 = dma.done.wait (%p3595_p13), %s360_s13, 4096  }
  0xb0   : > { %2589 = vsyncadd (%p3595_p13), %s360_s13, 4294963200  ;;  %p3596_p11 = scmp.eq.s32.totalorder %s2701_s9, 0 }
  0xb2   : > { %2591 = dma.done.wait (%p3596_p11), [#allocation6], 1024   ;;  %p3597_p7 = pmov %p3596_p11 }
  0xb4   : > { %2593 = vsyncadd (%p3597_p7), [#allocation6], 4294966272  ;;  %p3598_p12 = pmov %p3597_p7 }
  0xb5   : > { %p3599_p1 = pmov %p3597_p7 }
  0xb6   : > { %2595 = dma.done.wait (%p3598_p12), [#allocation9], 2048  }
  0xb7   : > { %2597 = vsyncadd (%p3599_p1), [#allocation9], 4294965248  ;;  %v2214_v0 = vld [vmem:[#allocation8] sm:$0xff]   ;;  %v2215_v1 = vld [vmem:[#allocation8 + $0x8] sm:$0xff]   ;;  %s3063_s26 = scalar_lea.vmem [#allocation12], %s2933_s10  ;;  %s1855_s18 = sshll.u32 %s2701_s9, 12 }
  0xb8   : > { %1929 = vmatprep.subr.bf16.mxu0 %v2214_v0  ;;  %2073 = vmatprep.subr.bf16.mxu1 %v2214_v0  ;;  %v2216_v2 = vld [vmem:[#allocation8 + $0x10] sm:$0xff]   ;;  %v2217_v3 = vld [vmem:[#allocation8 + $0x18] sm:$0xff]   ;;  %v487_v4 = vld [vmem:[%s2945_s27] sm:$0xff]  ;;  %s3410_s20 = scalar_lea.hbm %s3572_s8, %s1855_s18  ;;  %s1643_s24 = sshll.u32 %s3063_s26, 4  ;;  %s3413_s24 = int_to_ptr.vmem [resolvable:$true] %s1643_s24 }
  0xb9   : > { %1930 = vmatpush3.bf16.msra.mxu0 %v2214_v0  ;;  %2081 = vmatpush3.bf16.msra.mxu1 %v2214_v0  ;;  %v488_v5 = vld [vmem:[%s2945_s27 + $0x8] sm:$0xff]  ;;  %v2218_v7 = vld [vmem:[#allocation8 + $0x20] sm:$0xff]   ;;  %v2220_v9 = vld [vmem:[#allocation8 + $0x30] sm:$0xff]   ;;  %s1614_s12 = scalar_lea.sflag [#allocation13], %s2930_s3  ;;  %s2510_s15 = scalar_lea.vmem %s3413_s24, 4096 }
  0xba   : > { %1931 = vmatprep.subr.bf16.mxu0 %v2215_v1  ;;  %2074 = vmatprep.subr.bf16.mxu1 %v2215_v1  ;;  %v519_v6 = vpack.c.bf16 %v488_v5, %v487_v4  ;;  %v2219_v8 = vld [vmem:[#allocation8 + $0x28] sm:$0xff]   ;;  %v2221_v10 = vld [vmem:[#allocation8 + $0x38] sm:$0xff]   ;;  %v503_v11 = vld [vmem:[%s2945_s27 + $0x80] sm:$0xff]  ;;  %p2511_p2 = scmp.ne.s32.totalorder %s3413_s24, %s2510_s15 }
  0xbb   : > { %v489_v12 = vld [vmem:[%s2945_s27 + $0x10] sm:$0xff]  ;;  %v490_v13 = vld [vmem:[%s2945_s27 + $0x18] sm:$0xff]  ;;  %v504_v14 = vld [vmem:[%s2945_s27 + $0x88] sm:$0xff] }
  0xbc   : > { %1945 = vmatprep.mubr.bf16.mxu0 %v519_v6  ;;  %v2222_v15 = vld [vmem:[#allocation7] sm:$0xff]   ;;  %v492_v17 = vld [vmem:[%s2945_s27 + $0x28] sm:$0xff]  ;;  %v527_v18 = vpack.c.bf16 %v504_v14, %v503_v11  ;;  %v505_v19 = vld [vmem:[%s2945_s27 + $0x90] sm:$0xff]  ;;  %v520_v21 = vpack.c.bf16 %v490_v13, %v489_v12  ;;  %p2512_p4 = pnand %p2511_p2, %p2834_p5 }
  0xbd   : > { %1932 = vmatpush3.bf16.msra.mxu0 %v2215_v1  ;;  %2082 = vmatpush3.bf16.msra.mxu1 %v2215_v1  ;;  %v491_v16 = vld [vmem:[%s2945_s27 + $0x20] sm:$0xff]  ;;  %v506_v20 = vld [vmem:[%s2945_s27 + $0x98] sm:$0xff]  ;;  %v508_v23 = vld [vmem:[%s2945_s27 + $0xa8] sm:$0xff] }
  0xbe   : > { %1933 = vmatprep.subr.bf16.mxu0 %v2216_v2  ;;  %2075 = vmatprep.subr.bf16.mxu1 %v2216_v2  ;;  %v507_v22 = vld [vmem:[%s2945_s27 + $0xa0] sm:$0xff]  ;;  %v521_v24 = vpack.c.bf16 %v492_v17, %v491_v16  ;;  %v2223_v25 = vld [vmem:[#allocation7 + $0x8] sm:$0xff]   ;;  %v528_v26 = vpack.c.bf16 %v506_v20, %v505_v19  ;;  %v493_v28 = vld [vmem:[%s2945_s27 + $0x30] sm:$0xff]  ;;  %p2513_p0 = pneg %p2512_p4 }
  0xbf   : > { %1961 = vmatprep.mubr.bf16.mxu1 %v527_v18  ;;  %v529_v27 = vpack.c.bf16 %v508_v23, %v507_v22  ;;  %v494_v29 = vld [vmem:[%s2945_s27 + $0x38] sm:$0xff]  ;;  %v2224_v30 = vld [vmem:[#allocation7 + $0x10] sm:$0xff]   ;;  %v495_v31 = vld [vmem:[%s2945_s27 + $0x40] sm:$0xff] }
  0xc0   : > { %v496_v32 = vld [vmem:[%s2945_s27 + $0x48] sm:$0xff]  ;;  %v509_v33 = vld [vmem:[%s2945_s27 + $0xb0] sm:$0xff]  ;;  %v510_v34 = vld [vmem:[%s2945_s27 + $0xb8] sm:$0xff]  ;;  %v522_v37 = vpack.c.bf16 %v494_v29, %v493_v28 }
  0xc1   : > { %1934 = vmatpush3.bf16.msra.mxu0 %v2216_v2  ;;  %2083 = vmatpush3.bf16.msra.mxu1 %v2216_v2  ;;  %v511_v35 = vld [vmem:[%s2945_s27 + $0xc0] sm:$0xff]  ;;  %v512_v36 = vld [vmem:[%s2945_s27 + $0xc8] sm:$0xff]  ;;  %v523_v39 = vpack.c.bf16 %v496_v32, %v495_v31  ;;  %v2225_v41 = vld [vmem:[#allocation7 + $0x18] sm:$0xff]   ;;  %v530_v42 = vpack.c.bf16 %v510_v34, %v509_v33 }
  0xc2   : > { %1935 = vmatprep.subr.bf16.mxu0 %v2217_v3  ;;  %2076 = vmatprep.subr.bf16.mxu1 %v2217_v3  ;;  %v2230_v38 = vld [vmem:[#allocation10] sm:$0xff]   ;;  %v2231_v40 = vld [vmem:[#allocation10 + $0x8] sm:$0xff]   ;;  %v497_v43 = vld [vmem:[%s2945_s27 + $0x50] sm:$0xff]  ;;  %v531_v45 = vpack.c.bf16 %v512_v36, %v511_v35 }
  0xc3   : > { %v498_v44 = vld [vmem:[%s2945_s27 + $0x58] sm:$0xff]  ;;  %v2226_v46 = vld [vmem:[#allocation7 + $0x20] sm:$0xff]   ;;  %v2232_v47 = vld [vmem:[#allocation10 + $0x10] sm:$0xff]  }
  0xc4   : > { %v499_v48 = vld [vmem:[%s2945_s27 + $0x60] sm:$0xff]  ;;  %v500_v49 = vld [vmem:[%s2945_s27 + $0x68] sm:$0xff]  ;;  %v513_v50 = vld [vmem:[%s2945_s27 + $0xd0] sm:$0xff]  ;;  %v524_v52 = vpack.c.bf16 %v498_v44, %v497_v43 }
  0xc5   : > { %1936 = vmatpush3.bf16.msra.mxu0 %v2217_v3  ;;  %2084 = vmatpush3.bf16.msra.mxu1 %v2217_v3  ;;  %v514_v51 = vld [vmem:[%s2945_s27 + $0xd8] sm:$0xff]  ;;  %v515_v53 = vld [vmem:[%s2945_s27 + $0xe0] sm:$0xff]  ;;  %v516_v54 = vld [vmem:[%s2945_s27 + $0xe8] sm:$0xff]  ;;  %v525_v56 = vpack.c.bf16 %v500_v49, %v499_v48 }
  0xc6   : > { %1937 = vmatprep.subr.bf16.mxu0 %v2218_v7  ;;  %2077 = vmatprep.subr.bf16.mxu1 %v2218_v7  ;;  %v2233_v55 = vld [vmem:[#allocation10 + $0x18] sm:$0xff]   ;;  %v2227_v57 = vld [vmem:[#allocation7 + $0x28] sm:$0xff]   ;;  %v532_v58 = vpack.c.bf16 %v514_v51, %v513_v50  ;;  %v533_v59 = vpack.c.bf16 %v516_v54, %v515_v53  ;;  %v2234_v60 = vld [vmem:[#allocation10 + $0x20] sm:$0xff]  }
  0xc7   : > { %v501_v61 = vld [vmem:[%s2945_s27 + $0x70] sm:$0xff]  ;;  %v502_v62 = vld [vmem:[%s2945_s27 + $0x78] sm:$0xff]  ;;  %v423_v0 = vld [vmem:[%s2937_s25] sm:$0xff] }
  0xc8   : > { %v2228_v63 = vld [vmem:[#allocation7 + $0x30] sm:$0xff]   ;;  %v424_v1 = vld [vmem:[%s2937_s25 + $0x8] sm:$0xff]  ;;  %v518_v3 = vld [vmem:[%s2945_s27 + $0xf8] sm:$0xff]  ;;  %v526_v4 = vpack.c.bf16 %v502_v62, %v501_v61 }
  0xc9   : > { %1938 = vmatpush3.bf16.msra.mxu0 %v2218_v7  ;;  %2085 = vmatpush3.bf16.msra.mxu1 %v2218_v7  ;;  %v517_v2 = vld [vmem:[%s2945_s27 + $0xf0] sm:$0xff]  ;;  %v2235_v5 = vld [vmem:[#allocation10 + $0x28] sm:$0xff]   ;;  %v455_v6 = vpack.c.bf16 %v424_v1, %v423_v0  ;;  %v2229_v7 = vld [vmem:[#allocation7 + $0x38] sm:$0xff]  }
  0xca   : > { %1939 = vmatprep.subr.bf16.mxu0 %v2219_v8  ;;  %2078 = vmatprep.subr.bf16.mxu1 %v2219_v8  ;;  %v427_v11 = vld [vmem:[%s2937_s25 + $0x20] sm:$0xff]  ;;  %v428_v12 = vld [vmem:[%s2937_s25 + $0x28] sm:$0xff]  ;;  %v430_v16 = vld [vmem:[%s2937_s25 + $0x38] sm:$0xff] }
  0xcb   : > { %v457_v14 = vpack.c.bf16 %v428_v12, %v427_v11  ;;  %v431_v17 = vld [vmem:[%s2937_s25 + $0x40] sm:$0xff]  ;;  %v432_v18 = vld [vmem:[%s2937_s25 + $0x48] sm:$0xff]  ;;  %v434_v22 = vld [vmem:[%s2937_s25 + $0x58] sm:$0xff] }
  0xcc   : > { %v459_v20 = vpack.c.bf16 %v432_v18, %v431_v17  ;;  %v435_v23 = vld [vmem:[%s2937_s25 + $0x60] sm:$0xff]  ;;  %v438_v28 = vld [vmem:[%s2937_s25 + $0x78] sm:$0xff]  ;;  %v441_v33 = vld [vmem:[%s2937_s25 + $0x90] sm:$0xff] }
  0xcd   : > { %1940 = vmatpush3.bf16.msra.mxu0 %v2219_v8  ;;  %2086 = vmatpush3.bf16.msra.mxu1 %v2219_v8  ;;  %v534_v8 = vpack.c.bf16 %v518_v3, %v517_v2  ;;  %v439_v29 = vld [vmem:[%s2937_s25 + $0x80] sm:$0xff]  ;;  %v442_v34 = vld [vmem:[%s2937_s25 + $0x98] sm:$0xff]  ;;  %v444_v36 = vld [vmem:[%s2937_s25 + $0xa8] sm:$0xff] }
  0xce   : > { %1941 = vmatprep.subr.bf16.mxu0 %v2220_v9  ;;  %2079 = vmatprep.subr.bf16.mxu1 %v2220_v9  ;;  %v443_v35 = vld [vmem:[%s2937_s25 + $0xa0] sm:$0xff]  ;;  %v452_v48 = vld [vmem:[%s2937_s25 + $0xe8] sm:$0xff]  ;;  %v453_v51 = vld [vmem:[%s2937_s25 + $0xf0] sm:$0xff] }
  0xcf   : > { %v2236_v54 = vld [vmem:[#allocation10 + $0x30] sm:$0xff]  }
  0xd1   : > { %1942 = vmatpush3.bf16.msra.mxu0 %v2220_v9  ;;  %2087 = vmatpush3.bf16.msra.mxu1 %v2220_v9  ;;  %v425_v9 = vld [vmem:[%s2937_s25 + $0x10] sm:$0xff] }
  0xd2   : > { %1943 = vmatprep.subr.bf16.mxu0 %v2221_v10  ;;  %2080 = vmatprep.subr.bf16.mxu1 %v2221_v10 }
  0xd5   : > { %1944 = vmatpush3.bf16.msra.mxu0 %v2221_v10  ;;  %2088 = vmatpush3.bf16.msra.mxu1 %v2221_v10  ;;  %v426_v10 = vld [vmem:[%s2937_s25 + $0x18] sm:$0xff] }
  0xd6   : > { %1977 = vmatprep.subr.bf16.mxu0 %v2222_v15  ;;  %2025 = vmatprep.subr.bf16.mxu1 %v2230_v38  ;;  %v456_v13 = vpack.c.bf16 %v426_v10, %v425_v9 }
  0xd8   : > { %1946 = vmatmul.mubr.bf16.vlgmr.msra.gmra.mrb[0].mxu0 %v520_v21  ;;  %1962 = vmatmul.mubr.bf16.vlgmr.msra.gmra.mrb[0].mxu1 %v528_v26  ;;  %v433_v21 = vld [vmem:[%s2937_s25 + $0x50] sm:$0xff] }
  0xd9   : > { %1978 = vmatpush3.bf16.msra.mxu0 %v2222_v15  ;;  %1949 = vmatprep.mubr.bf16.mxu0 %v521_v24  ;;  %v429_v15 = vld [vmem:[%s2937_s25 + $0x30] sm:$0xff]  ;;  %v436_v24 = vld [vmem:[%s2937_s25 + $0x68] sm:$0xff] }
  0xda   : > { %1979 = vmatprep.subr.bf16.mxu0 %v2223_v25  ;;  %1965 = vmatprep.mubr.bf16.mxu1 %v529_v27  ;;  %v458_v19 = vpack.c.bf16 %v430_v16, %v429_v15  ;;  %v461_v26 = vpack.c.bf16 %v436_v24, %v435_v23  ;;  %v437_v27 = vld [vmem:[%s2937_s25 + $0x70] sm:$0xff] }
  0xdb   : > { %2026 = vmatpush3.bf16.msra.mxu1 %v2230_v38  ;;  %v462_v31 = vpack.c.bf16 %v438_v28, %v437_v27  ;;  %v465_v38 = vpack.c.bf16 %v444_v36, %v443_v35 }
  0xdc   : > { %2027 = vmatprep.subr.bf16.mxu1 %v2231_v40 }
  0xdd   : > { %1980 = vmatpush3.bf16.msra.mxu0 %v2223_v25  ;;  %v460_v25 = vpack.c.bf16 %v434_v22, %v433_v21 }
  0xde   : > { %1981 = vmatprep.subr.bf16.mxu0 %v2224_v30 }
  0xdf   : > { %2028 = vmatpush3.bf16.msra.mxu1 %v2231_v40  ;;  %v446_v40 = vld [vmem:[%s2937_s25 + $0xb8] sm:$0xff] }
  0xe0   : > { %1950 = vmatmul.mubr.bf16.gmra.mrb[4].mxu0 %v522_v37  ;;  %1966 = vmatmul.mubr.bf16.gmra.mrb[4].mxu1 %v530_v42  ;;  %v464_v37 = vpack.c.bf16 %v442_v34, %v441_v33  ;;  %v448_v42 = vld [vmem:[%s2937_s25 + $0xc8] sm:$0xff] }
  0xe1   : > { %1982 = vmatpush3.bf16.msra.mxu0 %v2224_v30  ;;  %1953 = vmatprep.mubr.bf16.mxu0 %v523_v39  ;;  %v440_v30 = vld [vmem:[%s2937_s25 + $0x88] sm:$0xff]  ;;  %v445_v39 = vld [vmem:[%s2937_s25 + $0xb0] sm:$0xff] }
  0xe2   : > { %1983 = vmatprep.subr.bf16.mxu0 %v2225_v41  ;;  %1969 = vmatprep.mubr.bf16.mxu1 %v531_v45  ;;  %v463_v32 = vpack.c.bf16 %v440_v30, %v439_v29  ;;  %v466_v43 = vpack.c.bf16 %v446_v40, %v445_v39  ;;  %v449_v45 = vld [vmem:[%s2937_s25 + $0xd0] sm:$0xff] }
  0xe3   : > { %2029 = vmatprep.subr.bf16.mxu1 %v2232_v47 }
  0xe4   : > { %2030 = vmatpush3.bf16.msra.mxu1 %v2232_v47  ;;  %v451_v47 = vld [vmem:[%s2937_s25 + $0xe0] sm:$0xff] }
  0xe5   : > { %1984 = vmatpush3.bf16.msra.mxu0 %v2225_v41  ;;  %2031 = vmatprep.subr.bf16.mxu1 %v2233_v55  ;;  %v447_v41 = vld [vmem:[%s2937_s25 + $0xc0] sm:$0xff]  ;;  %v469_v50 = vpack.c.bf16 %v452_v48, %v451_v47 }
  0xe6   : > { %1985 = vmatprep.subr.bf16.mxu0 %v2226_v46  ;;  %v467_v44 = vpack.c.bf16 %v448_v42, %v447_v41 }
  0xe8   : > { %1954 = vmatmul.mubr.bf16.gmra.mrb[8].mxu0 %v524_v52  ;;  %1970 = vmatmul.mubr.bf16.gmra.mrb[8].mxu1 %v532_v58  ;;  %v454_v52 = vld [vmem:[%s2937_s25 + $0xf8] sm:$0xff] }
  0xe9   : > { %1986 = vmatpush3.bf16.msra.mxu0 %v2226_v46  ;;  %1957 = vmatprep.mubr.bf16.mxu0 %v525_v56  ;;  %v450_v46 = vld [vmem:[%s2937_s25 + $0xd8] sm:$0xff]  ;;  %v470_v53 = vpack.c.bf16 %v454_v52, %v453_v51  ;;  %s2631_s25 = smov [#allocation12]  }
  0xea   : > { %1987 = vmatprep.subr.bf16.mxu0 %v2227_v57  ;;  %1973 = vmatprep.mubr.bf16.mxu1 %v533_v59  ;;  %v468_v49 = vpack.c.bf16 %v450_v46, %v449_v45  ;;  %s2514_s2 = sshll.u32 %s2631_s25, 4  ;;  %s2515_s2 = int_to_ptr.vmem [resolvable:$false] %s2514_s2 }
  0xeb   : > { %2032 = vmatpush3.bf16.msra.mxu1 %v2233_v55  ;;  %v2237_v55 = vld [vmem:[#allocation10 + $0x38] sm:$0xff]   ;;  %s2516_s13 = scalar_lea.vmem %s2515_s2, 8192  ;;  %p2517_p8 = scmp.lt.s32.totalorder %s3413_s24, %s2515_s2 }
  0xec   : > { %2033 = vmatprep.subr.bf16.mxu1 %v2234_v60  ;;  %p2518_p6 = scmp.lt.s32.totalorder %s2516_s13, %s2510_s15 }
  0xed   : > { %1988 = vmatpush3.bf16.msra.mxu0 %v2227_v57 }
  0xee   : > { %1989 = vmatprep.subr.bf16.mxu0 %v2228_v63  ;;  %p2519_p10 = por %p2518_p6, %p2517_p8 }
  0xef   : > { %2034 = vmatpush3.bf16.msra.mxu1 %v2234_v60 }
  0xf0   : > { %1958 = vmatmul.mubr.bf16.gmra.mrb[12].mxu0 %v526_v4  ;;  %2035 = vmatprep.subr.bf16.mxu1 %v2235_v5  ;;  %p2520_p3 = pnand %p2519_p10, %p2513_p0 }
  0xf1   : > { %1990 = vmatpush3.bf16.msra.mxu0 %v2228_v63  ;;  %1993 = vmatprep.mubr.bf16.mxu0 %v455_v6 }
  0xf2   : > { %1991 = vmatprep.subr.bf16.mxu0 %v2229_v7  ;;  %1974 = vmatmul.mubr.bf16.gmra.mrb[12].mxu1 %v534_v8  ;;  %v3058_v8 = vld [vmem:[%s3568_s4] ss:$0 sm:$0xff] }
  0xf3   : > { %2036 = vmatpush3.bf16.msra.mxu1 %v2235_v5 }
  0xf4   : > { %2037 = vmatprep.subr.bf16.mxu1 %v2236_v54 }
  0xf5   : > { %1992 = vmatpush3.bf16.msra.mxu0 %v2229_v7 }
  0xf7   : > { %2038 = vmatpush3.bf16.msra.mxu1 %v2236_v54 }
  0xf8   : > { %1994 = vmatmul.mubr.bf16.vlgmr.msra.gmra.mrb[0].mxu0 %v456_v13  ;;  %2039 = vmatprep.subr.bf16.mxu1 %v2237_v55 }
  0xf9   : > { %1997 = vmatprep.mubr.bf16.mxu0 %v457_v14 }
  0xfb   : > { %2040 = vmatpush3.bf16.msra.mxu1 %v2237_v55 }
 0x100   : > { %1998 = vmatmul.mubr.bf16.gmra.mrb[4].mxu0 %v458_v19 }
 0x101   : > { %2001 = vmatprep.mubr.bf16.mxu0 %v459_v20 }
 0x108   : > { %2002 = vmatmul.mubr.bf16.gmra.mrb[8].mxu0 %v460_v25 }
 0x109   : > { %2005 = vmatprep.mubr.bf16.mxu0 %v461_v26 }
 0x110   : > { %2006 = vmatmul.mubr.bf16.gmra.mrb[12].mxu0 %v462_v31 }
 0x111   : > { %2009 = vmatprep.mubr.bf16.mxu0 %v463_v32 }
 0x118   : > { %2010 = vmatmul.mubr.bf16.gmra.mrb[16].mxu0 %v464_v37 }
 0x119   : > { %2013 = vmatprep.mubr.bf16.mxu0 %v465_v38 }
 0x120   : > { %2014 = vmatmul.mubr.bf16.gmra.mrb[20].mxu0 %v466_v43 }
 0x121   : > { %2017 = vmatprep.mubr.bf16.mxu0 %v467_v44 }
 0x128   : > { %2018 = vmatmul.mubr.bf16.gmra.mrb[24].mxu0 %v468_v49 }
 0x129   : > { %2021 = vmatprep.mubr.bf16.mxu0 %v469_v50 }
 0x130   : > { %2022 = vmatmul.mubr.bf16.gmra.mrb[28].mxu0 %v470_v53 }
 0x1ab   : > { %v3023_v56 = vpop.f32.mrb[0].mxu1 }
 0x1ac   : > { %v3025_v57 = vpop.f32.mrb[1].mxu1 }
 0x1ad   : > { %v3027_v58 = vpop.f32.mrb[2].mxu1 }
 0x1ae   : > { %v3029_v59 = vpop.f32.mrb[3].mxu1 }
 0x1b3   : > { %v3031_v60 = vpop.f32.mrb[4].mxu1 }
 0x1b4   : > { %v3033_v61 = vpop.f32.mrb[5].mxu1 }
 0x1b5   : > { %v3035_v62 = vpop.f32.mrb[6].mxu1 }
 0x1b6   : > { %v3037_v63 = vpop.f32.mrb[7].mxu1 }
 0x1bb   : > { %v3039_v0 = vpop.f32.mrb[8].mxu1 }
 0x1bc   : > { %v3041_v1 = vpop.f32.mrb[9].mxu1 }
 0x1bd   : > { %v3043_v2 = vpop.f32.mrb[10].mxu1 }
 0x1be   : > { %v3045_v3 = vpop.f32.mrb[11].mxu1 }
 0x1c5   : > { %v3047_v4 = vpop.f32.mrb[12].mxu1 }
 0x1c6   : > { %v3049_v5 = vpop.f32.mrb[13].mxu1 }
 0x1c7   : > { %v3051_v6 = vpop.f32.mrb[14].mxu1 }
 0x1c8   : > { %v3053_v7 = vpop.f32.mrb[15].mxu1 }
 0x1cb   : > { %v1995_v9 = vpop.f32.mrb[0].mxu0 }
 0x1cc   : > { %v978_v10 = vadd.f32 %v1995_v9, %v3058_v8  ;;  %v842_v11 = vpop.f32.mrb[1].mxu0 }
 0x1cd   : > { %v976_v12 = vadd.f32 %v3058_v8, %v842_v11  ;;  %v1996_v13 = vpop.f32.mrb[2].mxu0 }
 0x1ce   : > { %1578 = vst [vmem:[%s3063_s26 + $0x10] sm:$0xff] %v978_v10  ;;  %v979_v14 = vadd.f32 %v1996_v13, %v3058_v8  ;;  %v845_v15 = vpop.f32.mrb[3].mxu0 }
 0x1cf   : > { %1576 = vst [vmem:[%s3063_s26] sm:$0xff] %v976_v12  ;;  %v977_v16 = vadd.f32 %v3058_v8, %v845_v15 }
 0x1d0   : > { %v1009_v17 = vpack.c.bf16 %v979_v14, %v978_v10  ;;  %1579 = vst [vmem:[%s3063_s26 + $0x18] sm:$0xff] %v979_v14 }
 0x1d1   : > { %v1008_v18 = vpack.c.bf16 %v977_v16, %v976_v12  ;;  %1577 = vst [vmem:[%s3063_s26 + $0x8] sm:$0xff] %v977_v16 }
 0x1d3   : > { %v1999_v19 = vpop.f32.mrb[4].mxu0  ;;  %2041 = vmatprep.mubr.bf16.mxu1 %v1008_v18 }
 0x1d4   : > { %v982_v20 = vadd.f32 %v1999_v19, %v3058_v8  ;;  %v858_v21 = vpop.f32.mrb[5].mxu0  ;;  %2042 = vmatmul.mubr.bf16.vlgmr.msra.gmra.mrb[16].mxu1 %v1009_v17 }
 0x1d5   : > { %v980_v22 = vadd.f32 %v3058_v8, %v858_v21  ;;  %v2000_v23 = vpop.f32.mrb[6].mxu0 }
 0x1d6   : > { %1582 = vst [vmem:[%s3063_s26 + $0x30] sm:$0xff] %v982_v20  ;;  %v983_v24 = vadd.f32 %v2000_v23, %v3058_v8  ;;  %v861_v25 = vpop.f32.mrb[7].mxu0 }
 0x1d7   : > { %1580 = vst [vmem:[%s3063_s26 + $0x20] sm:$0xff] %v980_v22  ;;  %v981_v26 = vadd.f32 %v3058_v8, %v861_v25 }
 0x1d8   : > { %v1011_v27 = vpack.c.bf16 %v983_v24, %v982_v20  ;;  %1583 = vst [vmem:[%s3063_s26 + $0x38] sm:$0xff] %v983_v24 }
 0x1d9   : > { %v1010_v28 = vpack.c.bf16 %v981_v26, %v980_v22  ;;  %1581 = vst [vmem:[%s3063_s26 + $0x28] sm:$0xff] %v981_v26 }
 0x1db   : > { %v2003_v29 = vpop.f32.mrb[8].mxu0  ;;  %2045 = vmatprep.mubr.bf16.mxu1 %v1010_v28 }
 0x1dc   : > { %v986_v30 = vadd.f32 %v2003_v29, %v3058_v8  ;;  %v874_v31 = vpop.f32.mrb[9].mxu0  ;;  %2046 = vmatmul.mubr.bf16.gmra.mrb[20].mxu1 %v1011_v27 }
 0x1dd   : > { %v984_v32 = vadd.f32 %v3058_v8, %v874_v31  ;;  %v2004_v33 = vpop.f32.mrb[10].mxu0 }
 0x1de   : > { %1586 = vst [vmem:[%s3063_s26 + $0x50] sm:$0xff] %v986_v30  ;;  %v987_v34 = vadd.f32 %v2004_v33, %v3058_v8  ;;  %v877_v35 = vpop.f32.mrb[11].mxu0 }
 0x1df   : > { %1584 = vst [vmem:[%s3063_s26 + $0x40] sm:$0xff] %v984_v32  ;;  %v985_v36 = vadd.f32 %v3058_v8, %v877_v35 }
 0x1e0   : > { %v1013_v37 = vpack.c.bf16 %v987_v34, %v986_v30  ;;  %1587 = vst [vmem:[%s3063_s26 + $0x58] sm:$0xff] %v987_v34 }
 0x1e1   : > { %v1012_v38 = vpack.c.bf16 %v985_v36, %v984_v32  ;;  %1585 = vst [vmem:[%s3063_s26 + $0x48] sm:$0xff] %v985_v36 }
 0x1e3   : > { %v2007_v39 = vpop.f32.mrb[12].mxu0  ;;  %2049 = vmatprep.mubr.bf16.mxu1 %v1012_v38 }
 0x1e4   : > { %v990_v40 = vadd.f32 %v2007_v39, %v3058_v8  ;;  %v890_v41 = vpop.f32.mrb[13].mxu0  ;;  %2050 = vmatmul.mubr.bf16.gmra.mrb[24].mxu1 %v1013_v37 }
 0x1e5   : > { %v988_v42 = vadd.f32 %v3058_v8, %v890_v41  ;;  %v2008_v43 = vpop.f32.mrb[14].mxu0 }
 0x1e6   : > { %1590 = vst [vmem:[%s3063_s26 + $0x70] sm:$0xff] %v990_v40  ;;  %v991_v44 = vadd.f32 %v2008_v43, %v3058_v8  ;;  %v893_v45 = vpop.f32.mrb[15].mxu0 }
 0x1e7   : > { %1588 = vst [vmem:[%s3063_s26 + $0x60] sm:$0xff] %v988_v42  ;;  %v989_v46 = vadd.f32 %v3058_v8, %v893_v45 }
 0x1e8   : > { %v1015_v47 = vpack.c.bf16 %v991_v44, %v990_v40  ;;  %1591 = vst [vmem:[%s3063_s26 + $0x78] sm:$0xff] %v991_v44 }
 0x1e9   : > { %v1014_v48 = vpack.c.bf16 %v989_v46, %v988_v42  ;;  %1589 = vst [vmem:[%s3063_s26 + $0x68] sm:$0xff] %v989_v46 }
 0x1eb   : > { %v2011_v49 = vpop.f32.mrb[16].mxu0  ;;  %2053 = vmatprep.mubr.bf16.mxu1 %v1014_v48 }
 0x1ec   : > { %v915_v50 = vadd.f32 %v2011_v49, %v3023_v56  ;;  %v906_v51 = vpop.f32.mrb[17].mxu0  ;;  %2054 = vmatmul.mubr.bf16.gmra.mrb[28].mxu1 %v1015_v47 }
 0x1ed   : > { %v907_v52 = vadd.f32 %v906_v51, %v3025_v57  ;;  %v2012_v53 = vpop.f32.mrb[18].mxu0 }
 0x1ee   : > { %v994_v54 = vadd.f32 %v3058_v8, %v915_v50  ;;  %v918_v55 = vadd.f32 %v2012_v53, %v3027_v58  ;;  %v909_v9 = vpop.f32.mrb[19].mxu0 }
 0x1ef   : > { %v992_v10 = vadd.f32 %v3058_v8, %v907_v52  ;;  %v910_v11 = vadd.f32 %v909_v9, %v3029_v59 }
 0x1f0   : > { %1594 = vst [vmem:[%s3063_s26 + $0x90] sm:$0xff] %v994_v54  ;;  %v995_v12 = vadd.f32 %v3058_v8, %v918_v55 }
 0x1f1   : > { %1592 = vst [vmem:[%s3063_s26 + $0x80] sm:$0xff] %v992_v10  ;;  %v993_v56 = vadd.f32 %v3058_v8, %v910_v11 }
 0x1f2   : > { %1595 = vst [vmem:[%s3063_s26 + $0x98] sm:$0xff] %v995_v12  ;;  %v1017_v13 = vpack.c.bf16 %v995_v12, %v994_v54 }
 0x1f3   : > { %1593 = vst [vmem:[%s3063_s26 + $0x88] sm:$0xff] %v993_v56  ;;  %v2015_v57 = vpop.f32.mrb[20].mxu0  ;;  %v1016_v14 = vpack.c.bf16 %v993_v56, %v992_v10 }
 0x1f4   : > { %v931_v58 = vadd.f32 %v2015_v57, %v3031_v60  ;;  %v922_v15 = vpop.f32.mrb[21].mxu0 }
 0x1f5   : > { %v923_v59 = vadd.f32 %v922_v15, %v3033_v61  ;;  %v2016_v16 = vpop.f32.mrb[22].mxu0  ;;  %2057 = vmatprep.mubr.bf16.mxu1 %v1016_v14 }
 0x1f6   : > { %v998_v17 = vadd.f32 %v3058_v8, %v931_v58  ;;  %v934_v18 = vadd.f32 %v2016_v16, %v3035_v62  ;;  %v925_v19 = vpop.f32.mrb[23].mxu0  ;;  %2058 = vmatmul.mubr.bf16.gmra.mrb[32].mxu1 %v1017_v13 }
 0x1f7   : > { %v996_v20 = vadd.f32 %v3058_v8, %v923_v59  ;;  %v926_v21 = vadd.f32 %v925_v19, %v3037_v63 }
 0x1f8   : > { %1598 = vst [vmem:[%s3063_s26 + $0xb0] sm:$0xff] %v998_v17  ;;  %v999_v22 = vadd.f32 %v3058_v8, %v934_v18 }
 0x1f9   : > { %1596 = vst [vmem:[%s3063_s26 + $0xa0] sm:$0xff] %v996_v20  ;;  %v997_v60 = vadd.f32 %v3058_v8, %v926_v21 }
 0x1fa   : > { %1599 = vst [vmem:[%s3063_s26 + $0xb8] sm:$0xff] %v999_v22  ;;  %v1019_v61 = vpack.c.bf16 %v999_v22, %v998_v17 }
 0x1fb   : > { %1597 = vst [vmem:[%s3063_s26 + $0xa8] sm:$0xff] %v997_v60  ;;  %v2019_v23 = vpop.f32.mrb[24].mxu0  ;;  %v1018_v24 = vpack.c.bf16 %v997_v60, %v996_v20 }
 0x1fc   : > { %v947_v62 = vadd.f32 %v2019_v23, %v3039_v0  ;;  %v938_v25 = vpop.f32.mrb[25].mxu0 }
 0x1fd   : > { %v939_v63 = vadd.f32 %v938_v25, %v3041_v1  ;;  %v2020_v26 = vpop.f32.mrb[26].mxu0  ;;  %2061 = vmatprep.mubr.bf16.mxu1 %v1018_v24 }
 0x1fe   : > { %v1002_v27 = vadd.f32 %v3058_v8, %v947_v62  ;;  %v950_v28 = vadd.f32 %v2020_v26, %v3043_v2  ;;  %v941_v29 = vpop.f32.mrb[27].mxu0  ;;  %2062 = vmatmul.mubr.bf16.gmra.mrb[36].mxu1 %v1019_v61 }
 0x1ff   : > { %v1000_v30 = vadd.f32 %v3058_v8, %v939_v63  ;;  %v942_v31 = vadd.f32 %v941_v29, %v3045_v3 }
 0x200   : > { %1602 = vst [vmem:[%s3063_s26 + $0xd0] sm:$0xff] %v1002_v27  ;;  %v1003_v32 = vadd.f32 %v3058_v8, %v950_v28 }
 0x201   : > { %1600 = vst [vmem:[%s3063_s26 + $0xc0] sm:$0xff] %v1000_v30  ;;  %v1001_v0 = vadd.f32 %v3058_v8, %v942_v31 }
 0x202   : > { %1603 = vst [vmem:[%s3063_s26 + $0xd8] sm:$0xff] %v1003_v32  ;;  %v1021_v1 = vpack.c.bf16 %v1003_v32, %v1002_v27 }
 0x203   : > { %1601 = vst [vmem:[%s3063_s26 + $0xc8] sm:$0xff] %v1001_v0  ;;  %v2023_v33 = vpop.f32.mrb[28].mxu0  ;;  %v1020_v34 = vpack.c.bf16 %v1001_v0, %v1000_v30 }
 0x204   : > { %v963_v2 = vadd.f32 %v2023_v33, %v3047_v4  ;;  %v954_v35 = vpop.f32.mrb[29].mxu0 }
 0x205   : > { %v955_v3 = vadd.f32 %v954_v35, %v3049_v5  ;;  %v2024_v36 = vpop.f32.mrb[30].mxu0  ;;  %2065 = vmatprep.mubr.bf16.mxu1 %v1020_v34 }
 0x206   : > { %v1006_v37 = vadd.f32 %v3058_v8, %v963_v2  ;;  %v966_v38 = vadd.f32 %v2024_v36, %v3051_v6  ;;  %v957_v39 = vpop.f32.mrb[31].mxu0  ;;  %2066 = vmatmul.mubr.bf16.gmra.mrb[40].mxu1 %v1021_v1  ;;  %v3146_v6 = vld [vmem:[%s3570_s6] ss:$0 sm:$0xff] }
 0x207   : > { %v1004_v40 = vadd.f32 %v3058_v8, %v955_v3  ;;  %v958_v41 = vadd.f32 %v957_v39, %v3053_v7 }
 0x208   : > { %1606 = vst [vmem:[%s3063_s26 + $0xf0] sm:$0xff] %v1006_v37  ;;  %v1007_v42 = vadd.f32 %v3058_v8, %v966_v38 }
 0x209   : > { %1604 = vst [vmem:[%s3063_s26 + $0xe0] sm:$0xff] %v1004_v40  ;;  %v1005_v4 = vadd.f32 %v3058_v8, %v958_v41 }
 0x20a   : > { %1607 = vst [vmem:[%s3063_s26 + $0xf8] sm:$0xff] %v1007_v42  ;;  %v1023_v5 = vpack.c.bf16 %v1007_v42, %v1006_v37 }
 0x20b   : > { %1605 = vst [vmem:[%s3063_s26 + $0xe8] sm:$0xff] %v1005_v4  ;;  %v1022_v43 = vpack.c.bf16 %v1005_v4, %v1004_v40 }
 0x20d   : > { %2069 = vmatprep.mubr.bf16.mxu1 %v1022_v43 }
 0x20e   : > { %2070 = vmatmul.mubr.bf16.gmra.mrb[44].mxu1 %v1023_v5 }
 0x2a7   : > { %v2043_v44 = vpop.f32.mrb[16].mxu1 }
 0x2a8   : > { %v3149_v7 = vadd.f32 %v2043_v44, %v3146_v6  ;;  %v1129_v45 = vpop.f32.mrb[17].mxu1 }
 0x2a9   : > { %v3152_v46 = vadd.f32 %v3146_v6, %v1129_v45  ;;  %v2044_v8 = vpop.f32.mrb[18].mxu1 }
 0x2aa   : > { %1260 = vmax.xlane.f32.xlu1 %v3149_v7  ;;  %v1132_v47 = vpop.f32.mrb[19].mxu1  ;;  %v3157_v48 = vadd.f32 %v2044_v8, %v3146_v6 }
 0x2ab   : > { %1256 = vmax.xlane.f32.xlu0 %v3152_v46  ;;  %v3160_v49 = vadd.f32 %v3146_v6, %v1132_v47 }
 0x2ae   : > { %1262 = vmax.xlane.f32.xlu1 %v3157_v48 }
 0x2af   : > { %1258 = vmax.xlane.f32.xlu0 %v3160_v49  ;;  %v2047_v50 = vpop.f32.mrb[20].mxu1 }
 0x2b0   : > { %v3165_v51 = vadd.f32 %v2047_v50, %v3146_v6  ;;  %v1145_v52 = vpop.f32.mrb[21].mxu1 }
 0x2b1   : > { %v2048_v53 = vpop.f32.mrb[22].mxu1  ;;  %v3173_v9 = vadd.f32 %v3146_v6, %v1145_v52 }
 0x2b2   : > { %v3168_v54 = vadd.f32 %v2048_v53, %v3146_v6  ;;  %v1148_v55 = vpop.f32.mrb[23].mxu1 }
 0x2b3   : > { %1268 = vmax.xlane.f32.xlu0 %v3165_v51  ;;  %v3176_v10 = vadd.f32 %v3146_v6, %v1148_v55 }
 0x2b4   : > { %1270 = vmax.xlane.f32.xlu1 %v3168_v54 }
 0x2b7   : > { %1264 = vmax.xlane.f32.xlu0 %v3173_v9  ;;  %v2051_v11 = vpop.f32.mrb[24].mxu1 }
 0x2b8   : > { %v3180_v12 = vadd.f32 %v2051_v11, %v3146_v6  ;;  %1266 = vmax.xlane.f32.xlu1 %v3176_v10  ;;  %v1161_v56 = vpop.f32.mrb[25].mxu1 }
 0x2b9   : > { %v2052_v13 = vpop.f32.mrb[26].mxu1  ;;  %v3189_v58 = vadd.f32 %v3146_v6, %v1161_v56 }
 0x2ba   : > { %v3184_v57 = vadd.f32 %v2052_v13, %v3146_v6  ;;  %v1164_v14 = vpop.f32.mrb[27].mxu1 }
 0x2bb   : > { %1276 = vmax.xlane.f32.xlu0 %v3180_v12  ;;  %v3192_v15 = vadd.f32 %v3146_v6, %v1164_v14 }
 0x2bc   : > { %1278 = vmax.xlane.f32.xlu1 %v3184_v57 }
 0x2bf   : > { %1272 = vmax.xlane.f32.xlu0 %v3189_v58  ;;  %v2055_v59 = vpop.f32.mrb[28].mxu1 }
 0x2c0   : > { %v3196_v16 = vadd.f32 %v2055_v59, %v3146_v6  ;;  %1274 = vmax.xlane.f32.xlu1 %v3192_v15  ;;  %v1177_v17 = vpop.f32.mrb[29].mxu1 }
 0x2c1   : > { %v2056_v18 = vpop.f32.mrb[30].mxu1  ;;  %v3205_v21 = vadd.f32 %v3146_v6, %v1177_v17 }
 0x2c2   : > { %v3200_v19 = vadd.f32 %v2056_v18, %v3146_v6  ;;  %v1180_v20 = vpop.f32.mrb[31].mxu1 }
 0x2c3   : > { %1284 = vmax.xlane.f32.xlu0 %v3196_v16  ;;  %v3208_v22 = vadd.f32 %v3146_v6, %v1180_v20 }
 0x2c4   : > { %1286 = vmax.xlane.f32.xlu1 %v3200_v19 }
 0x2c7   : > { %1280 = vmax.xlane.f32.xlu0 %v3205_v21 }
 0x2c8   : > { %1282 = vmax.xlane.f32.xlu1 %v3208_v22 }
 0x2c9   : > { %v2059_v60 = vpop.f32.mrb[32].mxu1 }
 0x2ca   : > { %v3213_v61 = vadd.f32 %v2059_v60, %v3146_v6  ;;  %v1193_v23 = vpop.f32.mrb[33].mxu1 }
 0x2cb   : > { %v2060_v24 = vpop.f32.mrb[34].mxu1  ;;  %v3220_v63 = vadd.f32 %v3146_v6, %v1193_v23 }
 0x2cc   : > { %v3216_v62 = vadd.f32 %v2060_v24, %v3146_v6  ;;  %1292 = vmax.xlane.f32.xlu0 %v3213_v61  ;;  %v1196_v25 = vpop.f32.mrb[35].mxu1 }
 0x2cd   : > { %v3224_v26 = vadd.f32 %v3146_v6, %v1196_v25 }
 0x2ce   : > { %1294 = vmax.xlane.f32.xlu1 %v3216_v62 }
 0x2d0   : > { %1288 = vmax.xlane.f32.xlu0 %v3220_v63 }
 0x2d1   : > { %v2063_v27 = vpop.f32.mrb[36].mxu1 }
 0x2d2   : > { %v3228_v28 = vadd.f32 %v2063_v27, %v3146_v6  ;;  %v1209_v29 = vpop.f32.mrb[37].mxu1  ;;  %1290 = vmax.xlane.f32.xlu1 %v3224_v26 }
 0x2d3   : > { %v2064_v30 = vpop.f32.mrb[38].mxu1  ;;  %v3236_v0 = vadd.f32 %v3146_v6, %v1209_v29 }
 0x2d4   : > { %v3232_v31 = vadd.f32 %v2064_v30, %v3146_v6  ;;  %v1212_v32 = vpop.f32.mrb[39].mxu1  ;;  %1300 = vmax.xlane.f32.xlu0 %v3228_v28 }
 0x2d5   : > { %v3240_v1 = vadd.f32 %v3146_v6, %v1212_v32 }
 0x2d6   : > { %1302 = vmax.xlane.f32.xlu1 %v3232_v31 }
 0x2d8   : > { %1296 = vmax.xlane.f32.xlu0 %v3236_v0 }
 0x2d9   : > { %v2067_v33 = vpop.f32.mrb[40].mxu1 }
 0x2da   : > { %v3244_v34 = vadd.f32 %v2067_v33, %v3146_v6  ;;  %v1225_v2 = vpop.f32.mrb[41].mxu1  ;;  %1298 = vmax.xlane.f32.xlu1 %v3240_v1 }
 0x2db   : > { %v2068_v35 = vpop.f32.mrb[42].mxu1  ;;  %v3252_v37 = vadd.f32 %v3146_v6, %v1225_v2 }
 0x2dc   : > { %v3248_v3 = vadd.f32 %v2068_v35, %v3146_v6  ;;  %v1228_v36 = vpop.f32.mrb[43].mxu1  ;;  %1308 = vmax.xlane.f32.xlu0 %v3244_v34 }
 0x2dd   : > { %v3256_v38 = vadd.f32 %v3146_v6, %v1228_v36 }
 0x2de   : > { %1310 = vmax.xlane.f32.xlu1 %v3248_v3 }
 0x2e0   : > { %1304 = vmax.xlane.f32.xlu0 %v3252_v37 }
 0x2e1   : > { %v2071_v39 = vpop.f32.mrb[44].mxu1 }
 0x2e2   : > { %v1241_v40 = vpop.f32.mrb[45].mxu1  ;;  %1306 = vmax.xlane.f32.xlu1 %v3256_v38  ;;  %v3271_v44 = vadd.f32 %v2071_v39, %v3146_v6 }
 0x2e3   : > { %v3261_v41 = vadd.f32 %v3146_v6, %v1241_v40  ;;  %v2072_v42 = vpop.f32.mrb[46].mxu1 }
 0x2e4   : > { %v3264_v4 = vadd.f32 %v2072_v42, %v3146_v6  ;;  %v1244_v5 = vpop.f32.mrb[47].mxu1 }
 0x2e5   : > { %v3267_v43 = vadd.f32 %v3146_v6, %v1244_v5  ;;  %1312 = vmax.xlane.f32.xlu0 %v3261_v41 }
 0x2e7   : > { %1314 = vmax.xlane.f32.xlu1 %v3267_v43 }
 0x2e9   : > { %1316 = vmax.xlane.f32.xlu0 %v3271_v44 }
 0x2eb   : > { %1318 = vmax.xlane.f32.xlu1 %v3264_v4 }
 0x337   : > { %v1261_v45 = vpop.xlane.xlu1 %1260 }
 0x338   : > { %v1322_v8 = vsub.f32 %v3149_v7, %v1261_v45  ;;  %v1257_v47 = vpop.xlane.xlu0 %1256 }
 0x339   : > { %v1320_v50 = vsub.f32 %v3152_v46, %v1257_v47 }
 0x33a   : > { %v1356_v52 = vmul.f32 1.442695, %v1322_v8 }
 0x33b   : > { %v1352_v53 = vmul.f32 1.442695, %v1320_v50  ;;  %v1263_v55 = vpop.xlane.xlu1 %1262 }
 0x33c   : > { %2238 = vpow2.f32 %v1356_v52  ;;  %v1323_v11 = vsub.f32 %v3157_v48, %v1263_v55  ;;  %v1259_v6 = vpop.xlane.xlu0 %1258 }
 0x33d   : > { %v1321_v56 = vsub.f32 %v3160_v49, %v1259_v6  ;;  %2240 = vpow2.f32 %v1352_v53 }
 0x33e   : > { %v1358_v13 = vmul.f32 1.442695, %v1323_v11 }
 0x33f   : > { %v1354_v14 = vmul.f32 1.442695, %v1321_v56 }
 0x340   : > { %2242 = vpow2.f32 %v1358_v13  ;;  %v1269_v59 = vpop.xlane.xlu0 %1268 }
 0x341   : > { %v1326_v17 = vsub.f32 %v3165_v51, %v1269_v59  ;;  %v1271_v7 = vpop.xlane.xlu1 %1270  ;;  %2244 = vpow2.f32 %v1354_v14 }
 0x342   : > { %v1327_v18 = vsub.f32 %v3168_v54, %v1271_v7 }
 0x343   : > { %v1364_v46 = vmul.f32 1.442695, %v1326_v17 }
 0x344   : > { %v1366_v20 = vmul.f32 1.442695, %v1327_v18  ;;  %v1265_v60 = vpop.xlane.xlu0 %1264 }
 0x345   : > { %2246 = vpow2.f32 %v1364_v46  ;;  %v1324_v48 = vsub.f32 %v3173_v9, %v1265_v60  ;;  %v1267_v23 = vpop.xlane.xlu1 %1266 }
 0x346   : > { %v3283_v24 = vpop.eup %2238  ;;  %v1325_v49 = vsub.f32 %v3176_v10, %v1267_v23  ;;  %2248 = vpow2.f32 %v1366_v20 }
 0x347   : > { %v1360_v25 = vmul.f32 1.442695, %v1324_v48  ;;  %1420 = vadd.xlane.f32.xlu0 %v3283_v24  ;;  %v3287_v29 = vpop.eup %2240 }
 0x348   : > { %v1362_v51 = vmul.f32 1.442695, %v1325_v49  ;;  %v1277_v27 = vpop.xlane.xlu0 %1276 }
 0x349   : > { %2250 = vpow2.f32 %v1360_v25  ;;  %v1330_v54 = vsub.f32 %v3180_v12, %v1277_v27  ;;  %v1279_v30 = vpop.xlane.xlu1 %1278 }
 0x34a   : > { %v3290_v32 = vpop.eup %2242  ;;  %v1331_v9 = vsub.f32 %v3184_v57, %v1279_v30  ;;  %2252 = vpow2.f32 %v1362_v51 }
 0x34b   : > { %v1372_v33 = vmul.f32 1.442695, %v1330_v54  ;;  %1422 = vadd.xlane.f32.xlu1 %v3290_v32  ;;  %1416 = vadd.xlane.f32.xlu0 %v3287_v29  ;;  %v3296_v39 = vpop.eup %2244 }
 0x34c   : > { %v1374_v10 = vmul.f32 1.442695, %v1331_v9  ;;  %v1273_v2 = vpop.xlane.xlu0 %1272 }
 0x34d   : > { %2254 = vpow2.f32 %v1372_v33  ;;  %v1328_v35 = vsub.f32 %v3189_v58, %v1273_v2  ;;  %v1275_v36 = vpop.xlane.xlu1 %1274 }
 0x34e   : > { %v1329_v12 = vsub.f32 %v3192_v15, %v1275_v36  ;;  %2256 = vpow2.f32 %v1374_v10 }
 0x34f   : > { %v3299_v40 = vpop.eup %2246  ;;  %v1368_v42 = vmul.f32 1.442695, %v1328_v35  ;;  %1418 = vadd.xlane.f32.xlu1 %v3296_v39 }
 0x350   : > { %v1370_v57 = vmul.f32 1.442695, %v1329_v12  ;;  %v1285_v5 = vpop.xlane.xlu0 %1284  ;;  %1428 = vadd.xlane.f32.xlu0 %v3299_v40  ;;  %v3304_v58 = vpop.eup %2248 }
 0x351   : > { %2258 = vpow2.f32 %v1368_v42  ;;  %v1334_v45 = vsub.f32 %v3196_v16, %v1285_v5  ;;  %v1287_v8 = vpop.xlane.xlu1 %1286 }
 0x352   : > { %v1335_v47 = vsub.f32 %v3200_v19, %v1287_v8  ;;  %2260 = vpow2.f32 %v1370_v57 }
 0x353   : > { %v3307_v50 = vpop.eup %2250  ;;  %v1380_v15 = vmul.f32 1.442695, %v1334_v45  ;;  %1430 = vadd.xlane.f32.xlu1 %v3304_v58 }
 0x354   : > { %v1382_v52 = vmul.f32 1.442695, %v1335_v47  ;;  %v1281_v53 = vpop.xlane.xlu0 %1280  ;;  %1424 = vadd.xlane.f32.xlu0 %v3307_v50  ;;  %v3312_v16 = vpop.eup %2252 }
 0x355   : > { %2262 = vpow2.f32 %v1380_v15  ;;  %v1332_v55 = vsub.f32 %v3205_v21, %v1281_v53  ;;  %v1283_v11 = vpop.xlane.xlu1 %1282 }
 0x356   : > { %v1333_v6 = vsub.f32 %v3208_v22, %v1283_v11  ;;  %2264 = vpow2.f32 %v1382_v52 }
 0x357   : > { %v3315_v56 = vpop.eup %2254  ;;  %v1376_v19 = vmul.f32 1.442695, %v1332_v55  ;;  %1426 = vadd.xlane.f32.xlu1 %v3312_v16 }
 0x358   : > { %v1378_v13 = vmul.f32 1.442695, %v1333_v6  ;;  %1436 = vadd.xlane.f32.xlu0 %v3315_v56  ;;  %v3319_v59 = vpop.eup %2256 }
 0x359   : > { %2266 = vpow2.f32 %v1376_v19  ;;  %v1293_v14 = vpop.xlane.xlu0 %1292 }
 0x35a   : > { %v1338_v21 = vsub.f32 %v3213_v61, %v1293_v14  ;;  %2268 = vpow2.f32 %v1378_v13 }
 0x35b   : > { %v3322_v17 = vpop.eup %2258  ;;  %v1295_v7 = vpop.xlane.xlu1 %1294  ;;  %1438 = vadd.xlane.f32.xlu1 %v3319_v59 }
 0x35c   : > { %v1388_v22 = vmul.f32 1.442695, %v1338_v21  ;;  %v1339_v18 = vsub.f32 %v3216_v62, %v1295_v7  ;;  %1432 = vadd.xlane.f32.xlu0 %v3322_v17  ;;  %v3327_v20 = vpop.eup %2260 }
 0x35d   : > { %v1289_v46 = vpop.xlane.xlu0 %1288 }
 0x35e   : > { %2270 = vpow2.f32 %v1388_v22  ;;  %v1390_v60 = vmul.f32 1.442695, %v1339_v18  ;;  %v1336_v48 = vsub.f32 %v3220_v63, %v1289_v46 }
 0x35f   : > { %v3330_v23 = vpop.eup %2262  ;;  %1434 = vadd.xlane.f32.xlu1 %v3327_v20  ;;  %v1291_v61 = vpop.xlane.xlu1 %1290 }
 0x360   : > { %2272 = vpow2.f32 %v1390_v60  ;;  %v1384_v49 = vmul.f32 1.442695, %v1336_v48  ;;  %v1337_v25 = vsub.f32 %v3224_v26, %v1291_v61  ;;  %1444 = vadd.xlane.f32.xlu0 %v3330_v23  ;;  %v3335_v51 = vpop.eup %2264 }
 0x361   : > { %v1301_v62 = vpop.xlane.xlu0 %1300 }
 0x362   : > { %2274 = vpow2.f32 %v1384_v49  ;;  %v1386_v27 = vmul.f32 1.442695, %v1337_v25  ;;  %v1342_v54 = vsub.f32 %v3228_v28, %v1301_v62 }
 0x363   : > { %v3338_v30 = vpop.eup %2266  ;;  %1446 = vadd.xlane.f32.xlu1 %v3335_v51  ;;  %v1303_v63 = vpop.xlane.xlu1 %1302 }
 0x364   : > { %2276 = vpow2.f32 %v1386_v27  ;;  %v1396_v9 = vmul.f32 1.442695, %v1342_v54  ;;  %v1343_v33 = vsub.f32 %v3232_v31, %v1303_v63  ;;  %1440 = vadd.xlane.f32.xlu0 %v3338_v30  ;;  %v3343_v10 = vpop.eup %2268 }
 0x365   : > { %v1297_v26 = vpop.xlane.xlu0 %1296 }
 0x366   : > { %2278 = vpow2.f32 %v1396_v9  ;;  %v1398_v2 = vmul.f32 1.442695, %v1343_v33  ;;  %v1340_v35 = vsub.f32 %v3236_v0, %v1297_v26 }
 0x367   : > { %1442 = vadd.xlane.f32.xlu1 %v3343_v10  ;;  %v1299_v28 = vpop.xlane.xlu1 %1298 }
 0x368   : > { %v3347_v36 = vpop.eup %2270  ;;  %2280 = vpow2.f32 %v1398_v2  ;;  %v1392_v12 = vmul.f32 1.442695, %v1340_v35  ;;  %v1341_v42 = vsub.f32 %v3240_v1, %v1299_v28 }
 0x369   : > { %1452 = vadd.xlane.f32.xlu0 %v3347_v36  ;;  %v1309_v31 = vpop.xlane.xlu0 %1308 }
 0x36a   : > { %v3351_v57 = vpop.eup %2272  ;;  %2282 = vpow2.f32 %v1392_v12  ;;  %v1394_v5 = vmul.f32 1.442695, %v1341_v42  ;;  %v1346_v45 = vsub.f32 %v3244_v34, %v1309_v31 }
 0x36b   : > { %1454 = vadd.xlane.f32.xlu1 %v3351_v57  ;;  %v1311_v0 = vpop.xlane.xlu1 %1310 }
 0x36c   : > { %v3355_v8 = vpop.eup %2274  ;;  %2284 = vpow2.f32 %v1394_v5  ;;  %v1404_v47 = vmul.f32 1.442695, %v1346_v45  ;;  %v1347_v15 = vsub.f32 %v3248_v3, %v1311_v0 }
 0x36d   : > { %1448 = vadd.xlane.f32.xlu0 %v3355_v8  ;;  %v1305_v1 = vpop.xlane.xlu0 %1304 }
 0x36e   : > { %v3359_v52 = vpop.eup %2276  ;;  %2286 = vpow2.f32 %v1404_v47  ;;  %v1406_v53 = vmul.f32 1.442695, %v1347_v15  ;;  %v1344_v55 = vsub.f32 %v3252_v37, %v1305_v1 }
 0x36f   : > { %1450 = vadd.xlane.f32.xlu1 %v3359_v52  ;;  %v1307_v34 = vpop.xlane.xlu1 %1306 }
 0x370   : > { %v3363_v11 = vpop.eup %2278  ;;  %2288 = vpow2.f32 %v1406_v53  ;;  %v1400_v6 = vmul.f32 1.442695, %v1344_v55  ;;  %v1345_v19 = vsub.f32 %v3256_v38, %v1307_v34 }
 0x371   : > { %1460 = vadd.xlane.f32.xlu0 %v3363_v11 }
 0x372   : > { %v3367_v3 = vpop.eup %2280  ;;  %2290 = vpow2.f32 %v1400_v6  ;;  %v1402_v13 = vmul.f32 1.442695, %v1345_v19  ;;  %v1313_v14 = vpop.xlane.xlu0 %1312 }
 0x373   : > { %v1348_v21 = vsub.f32 %v3261_v41, %v1313_v14  ;;  %1462 = vadd.xlane.f32.xlu1 %v3367_v3 }
 0x374   : > { %v3371_v37 = vpop.eup %2282  ;;  %2292 = vpow2.f32 %v1402_v13  ;;  %v1315_v7 = vpop.xlane.xlu1 %1314 }
 0x375   : > { %v1408_v22 = vmul.f32 1.442695, %v1348_v21  ;;  %v1349_v18 = vsub.f32 %v3267_v43, %v1315_v7  ;;  %1456 = vadd.xlane.f32.xlu0 %v3371_v37 }
 0x376   : > { %v3375_v38 = vpop.eup %2284  ;;  %v1317_v46 = vpop.xlane.xlu0 %1316 }
 0x377   : > { %2294 = vpow2.f32 %v1408_v22  ;;  %v1410_v60 = vmul.f32 1.442695, %v1349_v18  ;;  %v1350_v48 = vsub.f32 %v3271_v44, %v1317_v46  ;;  %1458 = vadd.xlane.f32.xlu1 %v3375_v38 }
 0x378   : > { %v3379_v41 = vpop.eup %2286  ;;  %v1319_v61 = vpop.xlane.xlu1 %1318 }
 0x379   : > { %2296 = vpow2.f32 %v1410_v60  ;;  %v1412_v49 = vmul.f32 1.442695, %v1350_v48  ;;  %v1351_v25 = vsub.f32 %v3264_v4, %v1319_v61  ;;  %1468 = vadd.xlane.f32.xlu0 %v3379_v41 }
 0x37a   : > { %v3383_v43 = vpop.eup %2288 }
 0x37b   : > { %2298 = vpow2.f32 %v1412_v49  ;;  %v1414_v62 = vmul.f32 1.442695, %v1351_v25  ;;  %1470 = vadd.xlane.f32.xlu1 %v3383_v43 }
 0x37c   : > { %v3386_v44 = vpop.eup %2290 }
 0x37d   : > { %2300 = vpow2.f32 %v1414_v62  ;;  %1464 = vadd.xlane.f32.xlu0 %v3386_v44 }
 0x37e   : > { %v3389_v27 = vpop.eup %2292 }
 0x37f   : > { %1466 = vadd.xlane.f32.xlu1 %v3389_v27 }
 0x381   : > { %v3392_v4 = vpop.eup %2294 }
 0x382   : > { %1472 = vadd.xlane.f32.xlu0 %v3392_v4 }
 0x383   : > { %v3395_v54 = vpop.eup %2296 }
 0x384   : > { %1474 = vadd.xlane.f32.xlu1 %v3395_v54 }
 0x385   : > { %v3398_v63 = vpop.eup %2298 }
 0x386   : > { %1476 = vadd.xlane.f32.xlu0 %v3398_v63 }
 0x387   : > { %v3401_v9 = vpop.eup %2300 }
 0x388   : > { %1478 = vadd.xlane.f32.xlu1 %v3401_v9 }
 0x389   : > { %2523 = shalt.err (!%p2520_p3)
}
 0x38a   : > { %s2524_s27 = scalar_lea.hbm %s3410_s20, 4096  ;;  %s2528_s26 = scalar_lea.hbm %s3572_s8, 8192 }
 0x38b   : > { %p2525_p9 = scmp.ne.s32.totalorder %s3410_s20, %s2524_s27  ;;  %p2529_p7 = scmp.lt.u32.totalorder %s3410_s20, %s3572_s8 }
 0x38c   : > { %p2530_p12 = scmp.lt.u32.totalorder %s2528_s26, %s2524_s27  ;;  %p2532_p2 = scmp.lt.u32.totalorder %s2524_s27, %s3410_s20 }
 0x38d   : > { %p2526_p13 = pnand %p2525_p9, %p2834_p5 }
 0x38e   : > { %p2531_p1 = por %p2530_p12, %p2529_p7 }
 0x38f   : > { %p2527_p11 = pneg %p2526_p13 }
 0x390   : > { %p2533_p4 = por %p2532_p2, %p2531_p1 }
 0x392   : > { %p2534_p0 = pnand %p2533_p4, %p2527_p11 }
 0x394   : > { %2537 = shalt.err (!%p2534_p0)
}
 0x395   : > { %s2632_s14 = smov 128   ;;  %s2633_s0 = smov 8  }
 0x396   : > { %2138 = dma.vmem_to_hbm [thread:$0]  (%p2834_p5), %s3413_s24, 4096, %s3410_s20, %s1614_s12, %s2632_s14, %s2632_s14, %s2633_s0  }
 0x397   : > { %s3444_s15 = scalar_lea.vmem [#allocation11], %s2933_s10  ;;  %s3514_s12 = scalar_lea.hbm %s3571_s7, %s1855_s18 }
 0x398   : > { %s1627_s10 = sshll.u32 %s3444_s15, 4  ;;  %s1609_s25 = scalar_lea.sflag [#allocation4], %s2930_s3  ;;  %s3516_s10 = int_to_ptr.vmem [resolvable:$true] %s1627_s10 }
 0x399   : > { %s2538_s2 = scalar_lea.vmem %s3516_s10, 4096  ;;  %s2634_s13 = smov [#allocation11]  }
 0x39a   : > { %p2539_p8 = scmp.ne.s32.totalorder %s3516_s10, %s2538_s2  ;;  %s2542_s27 = sshll.u32 %s2634_s13, 4  ;;  %s2543_s27 = int_to_ptr.vmem [resolvable:$false] %s2542_s27 }
 0x39b   : > { %s2544_s9 = scalar_lea.vmem %s2543_s27, 8192  ;;  %p2545_p3 = scmp.lt.s32.totalorder %s3516_s10, %s2543_s27 }
 0x39c   : > { %p2540_p6 = pnand %p2539_p8, %p2834_p5  ;;  %p2546_p9 = scmp.lt.s32.totalorder %s2544_s9, %s2538_s2 }
 0x39e   : > { %p2541_p10 = pneg %p2540_p6  ;;  %p2547_p13 = por %p2546_p9, %p2545_p3 }
 0x3a0   : > { %p2548_p11 = pnand %p2547_p13, %p2541_p10 }
 0x3d4   : > { %v1421_v33 = vpop.xlane.xlu0 %1420 }
 0x3d5   : > { %2302 = vrcp.f32 %v1421_v33 }
 0x3d8   : > { %v1423_v26 = vpop.xlane.xlu1 %1422  ;;  %v1417_v2 = vpop.xlane.xlu0 %1416 }
 0x3d9   : > { %2304 = vrcp.f32 %v1423_v26 }
 0x3da   : > { %2306 = vrcp.f32 %v1417_v2 }
 0x3dc   : > { %v1419_v35 = vpop.xlane.xlu1 %1418 }
 0x3dd   : > { %2308 = vrcp.f32 %v1419_v35  ;;  %v1429_v28 = vpop.xlane.xlu0 %1428 }
 0x3de   : > { %2310 = vrcp.f32 %v1429_v28 }
 0x3df   : > { %v2303_v12 = vpop.eup %2302 }
 0x3e0   : > { %v1514_v42 = vmul.f32 %v2303_v12, %v3283_v24  ;;  %v1431_v31 = vpop.xlane.xlu1 %1430 }
 0x3e1   : > { %2312 = vrcp.f32 %v1431_v31  ;;  %v1425_v5 = vpop.xlane.xlu0 %1424 }
 0x3e2   : > { %1546 = vst [vmem:[%s3444_s15 + $0x10] sm:$0xff] %v1514_v42  ;;  %2314 = vrcp.f32 %v1425_v5 }
 0x3e3   : > { %v2305_v45 = vpop.eup %2304 }
 0x3e4   : > { %v2307_v0 = vpop.eup %2306  ;;  %v1515_v47 = vmul.f32 %v2305_v45, %v3290_v32  ;;  %v1427_v15 = vpop.xlane.xlu1 %1426 }
 0x3e5   : > { %v1512_v1 = vmul.f32 %v2307_v0, %v3287_v29  ;;  %2316 = vrcp.f32 %v1427_v15  ;;  %v1437_v24 = vpop.xlane.xlu0 %1436 }
 0x3e6   : > { %1547 = vst [vmem:[%s3444_s15 + $0x18] sm:$0xff] %v1515_v47  ;;  %2318 = vrcp.f32 %v1437_v24 }
 0x3e7   : > { %v2309_v53 = vpop.eup %2308  ;;  %1544 = vst [vmem:[%s3444_s15] sm:$0xff] %v1512_v1 }
 0x3e8   : > { %v2311_v55 = vpop.eup %2310  ;;  %v1513_v34 = vmul.f32 %v2309_v53, %v3296_v39  ;;  %v1439_v6 = vpop.xlane.xlu1 %1438 }
 0x3e9   : > { %v1518_v19 = vmul.f32 %v2311_v55, %v3299_v40  ;;  %2320 = vrcp.f32 %v1439_v6  ;;  %v1433_v32 = vpop.xlane.xlu0 %1432 }
 0x3ea   : > { %1545 = vst [vmem:[%s3444_s15 + $0x8] sm:$0xff] %v1513_v34  ;;  %2322 = vrcp.f32 %v1433_v32 }
 0x3eb   : > { %v2313_v29 = vpop.eup %2312  ;;  %1550 = vst [vmem:[%s3444_s15 + $0x30] sm:$0xff] %v1518_v19 }
 0x3ec   : > { %v2315_v13 = vpop.eup %2314  ;;  %v1519_v14 = vmul.f32 %v2313_v29, %v3304_v58  ;;  %v1435_v21 = vpop.xlane.xlu1 %1434 }
 0x3ed   : > { %v1516_v7 = vmul.f32 %v2315_v13, %v3307_v50  ;;  %2324 = vrcp.f32 %v1435_v21  ;;  %v1445_v39 = vpop.xlane.xlu0 %1444 }
 0x3ee   : > { %1551 = vst [vmem:[%s3444_s15 + $0x38] sm:$0xff] %v1519_v14  ;;  %2326 = vrcp.f32 %v1445_v39 }
 0x3ef   : > { %v2317_v40 = vpop.eup %2316  ;;  %1548 = vst [vmem:[%s3444_s15 + $0x20] sm:$0xff] %v1516_v7 }
 0x3f0   : > { %v2319_v22 = vpop.eup %2318  ;;  %v1517_v18 = vmul.f32 %v2317_v40, %v3312_v16  ;;  %v1447_v46 = vpop.xlane.xlu1 %1446 }
 0x3f1   : > { %v1522_v60 = vmul.f32 %v2319_v22, %v3315_v56  ;;  %2328 = vrcp.f32 %v1447_v46  ;;  %v1441_v58 = vpop.xlane.xlu0 %1440 }
 0x3f2   : > { %1549 = vst [vmem:[%s3444_s15 + $0x28] sm:$0xff] %v1517_v18  ;;  %2330 = vrcp.f32 %v1441_v58 }
 0x3f3   : > { %v2321_v50 = vpop.eup %2320  ;;  %1554 = vst [vmem:[%s3444_s15 + $0x50] sm:$0xff] %v1522_v60 }
 0x3f4   : > { %v2323_v48 = vpop.eup %2322  ;;  %v1523_v61 = vmul.f32 %v2321_v50, %v3319_v59  ;;  %v1443_v49 = vpop.xlane.xlu1 %1442 }
 0x3f5   : > { %v1520_v25 = vmul.f32 %v2323_v48, %v3322_v17  ;;  %2332 = vrcp.f32 %v1443_v49 }
 0x3f6   : > { %1555 = vst [vmem:[%s3444_s15 + $0x58] sm:$0xff] %v1523_v61  ;;  %v1453_v16 = vpop.xlane.xlu0 %1452 }
 0x3f7   : > { %v2325_v62 = vpop.eup %2324  ;;  %1552 = vst [vmem:[%s3444_s15 + $0x40] sm:$0xff] %v1520_v25  ;;  %2334 = vrcp.f32 %v1453_v16 }
 0x3f8   : > { %v2327_v56 = vpop.eup %2326  ;;  %v1521_v33 = vmul.f32 %v2325_v62, %v3327_v20  ;;  %v1455_v26 = vpop.xlane.xlu1 %1454 }
 0x3f9   : > { %v1526_v2 = vmul.f32 %v2327_v56, %v3330_v23  ;;  %2336 = vrcp.f32 %v1455_v26 }
 0x3fa   : > { %1553 = vst [vmem:[%s3444_s15 + $0x48] sm:$0xff] %v1521_v33  ;;  %v1449_v59 = vpop.xlane.xlu0 %1448 }
 0x3fb   : > { %v2329_v35 = vpop.eup %2328  ;;  %1558 = vst [vmem:[%s3444_s15 + $0x70] sm:$0xff] %v1526_v2  ;;  %2338 = vrcp.f32 %v1449_v59 }
 0x3fc   : > { %v2331_v17 = vpop.eup %2330  ;;  %v1527_v28 = vmul.f32 %v2329_v35, %v3335_v51  ;;  %v1451_v12 = vpop.xlane.xlu1 %1450 }
 0x3fd   : > { %v1524_v42 = vmul.f32 %v2331_v17, %v3338_v30  ;;  %2340 = vrcp.f32 %v1451_v12 }
 0x3fe   : > { %1559 = vst [vmem:[%s3444_s15 + $0x78] sm:$0xff] %v1527_v28  ;;  %v1461_v20 = vpop.xlane.xlu0 %1460 }
 0x3ff   : > { %v2333_v31 = vpop.eup %2332  ;;  %1556 = vst [vmem:[%s3444_s15 + $0x60] sm:$0xff] %v1524_v42  ;;  %2342 = vrcp.f32 %v1461_v20 }
 0x400   : > { %v1525_v23 = vmul.f32 %v2333_v31, %v3343_v10  ;;  %v1463_v5 = vpop.xlane.xlu1 %1462 }
 0x401   : > { %v2335_v45 = vpop.eup %2334  ;;  %2344 = vrcp.f32 %v1463_v5 }
 0x402   : > { %1557 = vst [vmem:[%s3444_s15 + $0x68] sm:$0xff] %v1525_v23  ;;  %v1530_v51 = vmul.f32 %v2335_v45, %v3347_v36  ;;  %v1457_v0 = vpop.xlane.xlu0 %1456 }
 0x403   : > { %v2337_v47 = vpop.eup %2336  ;;  %2346 = vrcp.f32 %v1457_v0 }
 0x404   : > { %1562 = vst [vmem:[%s3444_s15 + $0x90] sm:$0xff] %v1530_v51  ;;  %v1531_v30 = vmul.f32 %v2337_v47, %v3351_v57  ;;  %v1459_v15 = vpop.xlane.xlu1 %1458 }
 0x405   : > { %v2339_v1 = vpop.eup %2338  ;;  %2348 = vrcp.f32 %v1459_v15 }
 0x406   : > { %1563 = vst [vmem:[%s3444_s15 + $0x98] sm:$0xff] %v1531_v30  ;;  %v1528_v10 = vmul.f32 %v2339_v1, %v3355_v8  ;;  %v1469_v24 = vpop.xlane.xlu0 %1468 }
 0x407   : > { %v2341_v53 = vpop.eup %2340  ;;  %2350 = vrcp.f32 %v1469_v24 }
 0x408   : > { %1560 = vst [vmem:[%s3444_s15 + $0x80] sm:$0xff] %v1528_v10  ;;  %v1529_v36 = vmul.f32 %v2341_v53, %v3359_v52  ;;  %v1471_v55 = vpop.xlane.xlu1 %1470 }
 0x409   : > { %v2343_v34 = vpop.eup %2342  ;;  %2352 = vrcp.f32 %v1471_v55 }
 0x40a   : > { %1561 = vst [vmem:[%s3444_s15 + $0x88] sm:$0xff] %v1529_v36  ;;  %v1534_v57 = vmul.f32 %v2343_v34, %v3363_v11  ;;  %v1465_v6 = vpop.xlane.xlu0 %1464 }
 0x40b   : > { %v2345_v19 = vpop.eup %2344  ;;  %2354 = vrcp.f32 %v1465_v6 }
 0x40c   : > { %1566 = vst [vmem:[%s3444_s15 + $0xb0] sm:$0xff] %v1534_v57  ;;  %v1535_v8 = vmul.f32 %v2345_v19, %v3367_v3  ;;  %v1467_v32 = vpop.xlane.xlu1 %1466 }
 0x40d   : > { %v2347_v29 = vpop.eup %2346  ;;  %2356 = vrcp.f32 %v1467_v32 }
 0x40e   : > { %1567 = vst [vmem:[%s3444_s15 + $0xb8] sm:$0xff] %v1535_v8  ;;  %v1532_v52 = vmul.f32 %v2347_v29, %v3371_v37 }
 0x40f   : > { %v2349_v13 = vpop.eup %2348  ;;  %v1473_v14 = vpop.xlane.xlu0 %1472 }
 0x410   : > { %1564 = vst [vmem:[%s3444_s15 + $0xa0] sm:$0xff] %v1532_v52  ;;  %v1533_v11 = vmul.f32 %v2349_v13, %v3375_v38  ;;  %2358 = vrcp.f32 %v1473_v14 }
 0x411   : > { %v2351_v21 = vpop.eup %2350  ;;  %v1475_v7 = vpop.xlane.xlu1 %1474 }
 0x412   : > { %1565 = vst [vmem:[%s3444_s15 + $0xa8] sm:$0xff] %v1533_v11  ;;  %v1538_v3 = vmul.f32 %v2351_v21, %v3379_v41  ;;  %2360 = vrcp.f32 %v1475_v7 }
 0x413   : > { %v2353_v39 = vpop.eup %2352  ;;  %v1477_v40 = vpop.xlane.xlu0 %1476 }
 0x414   : > { %1570 = vst [vmem:[%s3444_s15 + $0xd0] sm:$0xff] %v1538_v3  ;;  %v1539_v37 = vmul.f32 %v2353_v39, %v3383_v43  ;;  %2362 = vrcp.f32 %v1477_v40 }
 0x415   : > { %v2355_v22 = vpop.eup %2354  ;;  %v1479_v38 = vpop.xlane.xlu1 %1478 }
 0x416   : > { %1571 = vst [vmem:[%s3444_s15 + $0xd8] sm:$0xff] %v1539_v37  ;;  %v1536_v18 = vmul.f32 %v2355_v22, %v3386_v44  ;;  %2364 = vrcp.f32 %v1479_v38 }
 0x417   : > { %v2357_v46 = vpop.eup %2356 }
 0x418   : > { %1568 = vst [vmem:[%s3444_s15 + $0xc0] sm:$0xff] %v1536_v18  ;;  %v1537_v41 = vmul.f32 %v2357_v46, %v3389_v27 }
 0x41a   : > { %v2359_v60 = vpop.eup %2358  ;;  %1569 = vst [vmem:[%s3444_s15 + $0xc8] sm:$0xff] %v1537_v41 }
 0x41b   : > { %v1540_v43 = vmul.f32 %v2359_v60, %v3392_v4 }
 0x41c   : > { %v2361_v58 = vpop.eup %2360 }
 0x41d   : > { %1572 = vst [vmem:[%s3444_s15 + $0xe0] sm:$0xff] %v1540_v43  ;;  %v1541_v50 = vmul.f32 %v2361_v58, %v3395_v54 }
 0x41e   : > { %v2363_v48 = vpop.eup %2362 }
 0x41f   : > { %1573 = vst [vmem:[%s3444_s15 + $0xe8] sm:$0xff] %v1541_v50  ;;  %v1542_v44 = vmul.f32 %v2363_v48, %v3398_v63 }
 0x420   : > { %v2365_v61 = vpop.eup %2364 }
 0x421   : > { %1574 = vst [vmem:[%s3444_s15 + $0xf0] sm:$0xff] %v1542_v44  ;;  %v1543_v27 = vmul.f32 %v2365_v61, %v3401_v9 }
 0x423   : > { %1575 = vst [vmem:[%s3444_s15 + $0xf8] sm:$0xff] %v1543_v27 }
 0x424   : > { %2551 = shalt.err (!%p2548_p11)
}
 0x425   : > { %s2552_s18 = scalar_lea.hbm %s3514_s12, 4096  ;;  %s2556_s26 = scalar_lea.hbm %s3571_s7, 8192 }
 0x426   : > { %p2553_p7 = scmp.ne.s32.totalorder %s3514_s12, %s2552_s18  ;;  %p2557_p2 = scmp.lt.u32.totalorder %s3514_s12, %s3571_s7 }
 0x427   : > { %p2558_p4 = scmp.lt.u32.totalorder %s2556_s26, %s2552_s18  ;;  %p2560_p8 = scmp.lt.u32.totalorder %s2552_s18, %s3514_s12 }
 0x428   : > { %p2554_p12 = pnand %p2553_p7, %p2834_p5 }
 0x429   : > { %p2559_p0 = por %p2558_p4, %p2557_p2 }
 0x42a   : > { %p2555_p1 = pneg %p2554_p12 }
 0x42b   : > { %p2561_p6 = por %p2560_p8, %p2559_p0 }
 0x42d   : > { %p2562_p10 = pnand %p2561_p6, %p2555_p1 }
 0x42f   : > { %2565 = shalt.err (!%p2562_p10)
}
 0x430   : > { %2137 = dma.vmem_to_hbm [thread:$0]  (%p2834_p5), %s3516_s10, 4096, %s3514_s12, %s1609_s25, %s2632_s14, %s2632_s14, %s2633_s0  }
 0x431 PF: > { %s3600_s15 = sld [smem:[#allocation20_spill]]  ;;  %s3601_s20 = sld [smem:[#allocation21_spill]] }
 0x432   : > { %p3603_p9 = scmp.ge.s32.totalorder %s2620_s30, 2 }
 0x437   : > { %s1658_s24 = sand.u32 1, %s3600_s15   ;;  %p3602_p3 = scmp.ne.s32.totalorder %s3601_s20, 0 }
 0x438   : > { %s1659_s2 = scalar_lea.sflag [#allocation4], %s1658_s24 }
 0x439   : > { %p2159_p13 = pnand %p3603_p9, %p3602_p3 }
 0x43b   : > { %2599 = dma.done.wait (!%p2159_p13), %s1659_s2, 4096  }
 0x43c   : > { %2601 = vsyncadd (!%p2159_p13), %s1659_s2, 4294963200  ;;  %s1668_s23 = scalar_lea.sflag [#allocation13], %s1658_s24 }
 0x43d   : > { %2603 = dma.done.wait (!%p2159_p13), %s1668_s23, 4096  }
 0x43e   : > { %2605 = vsyncadd (!%p2159_p13), %s1668_s23, 4294963200  ;;  %p29_p5 = scmp.ge.s32.totalorder %s2820_s16, 4   ;;  %s3604_s27 = smov %s2612_s28 }
 0x43f   : > { %s3605_s28 = smov %s2616_s29  ;;  %s3606_s29 = smov %s2830_s22 }
 0x440   : > { %s3607_s30 = smov %s2820_s16  ;;  %31 = sbr.rel (!%p29_p5) target bundleno = 14 (0xe), region = 135 }
 0x447   :  { %1673 = vsyncpa [#allocation3], 1 }
 0x448   :  { %1675 = vsyncpa [#allocation3 + $0x1], 1 }
 0x449   :  { %1676 = vsyncpa [#allocation6], 1 }
 0x44a   :  { %1678 = vsyncpa [#allocation6 + $0x1], 1 }
 0x44b   :  { %1679 = vsyncpa [#allocation9], 1 }
 0x44c   :  { %1680 = vsyncpa [#allocation4], 1 }
 0x44d   :  { %1682 = vsyncpa [#allocation4 + $0x1], 1 }
 0x44e   :  { %1683 = vsyncpa [#allocation13], 1 }
 0x44f   :  { %1685 = vsyncpa [#allocation13 + $0x1], 1 }

</bundles_post_ra>
